<compile_context>
chip_gen: v5e
topology: v5e:2x2
jax: 0.10.0
libtpu: 0.0.40
codegen_flags: <defaults>
</compile_context>

<pallas_src>
import functools

import jax
import jax.numpy as jnp
from jax.experimental import pallas as pl
from jax.experimental.pallas import tpu as pltpu


def _leaky_relu(x, slope=0.2):
    # mul + max instead of compare + select: fewer VALU slots on the serial
    # hidden-layer chain.
    return jnp.maximum(x, slope * x)


def _round_up(x, m):
    return ((x + m - 1) // m) * m


def mlp_decoder_kernel(z_ref, w_in_ref, b_in_ref, wh_ref, bh_ref,
                       w_out_ref, b_out_ref, out_ref, *, num_hidden,
                       compute_dtype):
    """One batch tile: the whole MLP chain runs VMEM-resident.

    Weights arrive via constant-index BlockSpecs (fetched once, reused across
    all grid iterations). Matmul operands are cast to compute_dtype (f32 or
    bf16) but accumulate in f32; LeakyReLU and bias adds stay in f32.
    """
    x = z_ref[...].astype(compute_dtype)

    # Layer 0: Linear(latent, hidden) + LeakyReLU
    h = jnp.dot(x, w_in_ref[...],
                preferred_element_type=jnp.float32) + b_in_ref[...]
    h = _leaky_relu(h)

    # Hidden layers: (num_layers - 1) x [Linear(hidden, hidden) + LeakyReLU]
    for l in range(num_hidden):  # static unroll (num_hidden is a Python int)
        h = jnp.dot(h.astype(compute_dtype), wh_ref[l],
                    preferred_element_type=jnp.float32) + bh_ref[l]
        h = _leaky_relu(h)

    # Output layer: Linear(hidden, latent)
    y = jnp.dot(h.astype(compute_dtype), w_out_ref[...],
                preferred_element_type=jnp.float32) + b_out_ref[...]
    out_ref[...] = y.astype(out_ref.dtype)


def make_params(key, latent_size, hidden_dim, num_layers):
    """Deterministic synthetic parameters with the same shapes as the PyTorch module."""
    assert num_layers >= 2, "kernel expects at least one hidden Linear(H,H)"
    num_hidden = num_layers - 1
    keys = jax.random.split(key, 6)

    def init(k, shape, fan_in):
        return (jax.random.normal(k, shape, jnp.float32)
                / jnp.sqrt(fan_in)).astype(jnp.float32)

    # TODO(synk): PyTorch default init is Kaiming-uniform; synthetic
    # 1/sqrt(fan_in) normal init here only affects test data, not semantics.
    return {
        # Linear(latent, hidden)
        "w_in": init(keys[0], (latent_size, hidden_dim), latent_size),
        "b_in": init(keys[1], (1, hidden_dim), latent_size),
        # (num_layers - 1) x Linear(hidden, hidden)
        "wh": init(keys[2], (num_hidden, hidden_dim, hidden_dim), hidden_dim),
        "bh": init(keys[3], (num_hidden, 1, hidden_dim), hidden_dim),
        # Linear(hidden, latent)
        "w_out": init(keys[4], (hidden_dim, latent_size), hidden_dim),
        "b_out": init(keys[5], (1, latent_size), hidden_dim),
    }


def _pad_params(params, latent_size, hidden_dim, L_pad, H_pad, compute_dtype):
    """Zero-pad weights/biases to lane-dense (128-multiple) dims.

    Padded rows/cols/biases are exactly zero, so padded lanes carry zeros
    through the whole LeakyReLU chain (LeakyReLU(0) == 0) and the real output
    columns are unaffected.
    """
    num_hidden = params["wh"].shape[0]
    w_in = jnp.zeros((L_pad, H_pad), jnp.float32
                     ).at[:latent_size, :hidden_dim].set(params["w_in"])
    b_in = jnp.zeros((1, H_pad), jnp.float32
                     ).at[:, :hidden_dim].set(params["b_in"])
    wh = jnp.zeros((num_hidden, H_pad, H_pad), jnp.float32
                   ).at[:, :hidden_dim, :hidden_dim].set(params["wh"])
    bh = jnp.zeros((num_hidden, 1, H_pad), jnp.float32
                   ).at[:, :, :hidden_dim].set(params["bh"])
    w_out = jnp.zeros((H_pad, L_pad), jnp.float32
                      ).at[:hidden_dim, :latent_size].set(params["w_out"])
    b_out = jnp.zeros((1, L_pad), jnp.float32
                      ).at[:, :latent_size].set(params["b_out"])
    # Matmul operands in compute_dtype (halves weight DMA for bf16); biases
    # stay f32 so bias-add + LeakyReLU run in f32.
    return {
        "w_in": w_in.astype(compute_dtype), "b_in": b_in,
        "wh": wh.astype(compute_dtype), "bh": bh,
        "w_out": w_out.astype(compute_dtype), "b_out": b_out,
    }


def mlp_decoder_forward(z, params, *, latent_size, hidden_dim, num_layers,
                        b_tile=256, compute_dtype=jnp.float32):
    B, D = z.shape
    assert D == latent_size
    num_hidden = num_layers - 1

    # Lane-dense feature dims (multiples of the 128-lane vreg width).
    L_pad = _round_up(max(latent_size, 128), 128)
    H_pad = _round_up(max(hidden_dim, 128), 128)

    # Batch tile: multiple of 8 sublanes; pad batch up to a tile multiple.
    b_tile = max(8, _round_up(b_tile, 8))
    B_pad = _round_up(B, b_tile)

    # Zero-pad input to (B_pad, L_pad); padded lanes/rows are inert.
    z_p = jnp.zeros((B_pad, L_pad), jnp.float32).at[:B, :latent_size].set(z)

    p = _pad_params(params, latent_size, hidden_dim, L_pad, H_pad,
                    compute_dtype)

    grid = (B_pad // b_tile,)
    kernel = functools.partial(mlp_decoder_kernel, num_hidden=num_hidden,
                               compute_dtype=compute_dtype)

    in_specs = [
        # Streaming batch tiles (double-buffered by the pipeline).
        pl.BlockSpec((b_tile, L_pad), lambda i: (i, 0)),
        # Weights / biases: constant block index -> DMA'd once, VMEM-resident.
        pl.BlockSpec((L_pad, H_pad), lambda i: (0, 0)),
        pl.BlockSpec((1, H_pad), lambda i: (0, 0)),
        pl.BlockSpec((num_hidden, H_pad, H_pad), lambda i: (0, 0, 0)),
        pl.BlockSpec((num_hidden, 1, H_pad), lambda i: (0, 0, 0)),
        pl.BlockSpec((H_pad, L_pad), lambda i: (0, 0)),
        pl.BlockSpec((1, L_pad), lambda i: (0, 0)),
    ]
    # Lane-dense (b_tile, 128)-wide output block -> unmasked vst.
    out_spec = pl.BlockSpec((b_tile, L_pad), lambda i: (i, 0))

    w_itemsize = jnp.dtype(compute_dtype).itemsize
    flops = 2 * B_pad * (L_pad * H_pad
                         + num_hidden * H_pad * H_pad
                         + H_pad * L_pad)
    weight_bytes = (w_itemsize * (L_pad * H_pad
                                  + num_hidden * H_pad * H_pad
                                  + H_pad * L_pad)
                    + 4 * (H_pad + num_hidden * H_pad + L_pad))
    bytes_accessed = 4 * B_pad * L_pad * 2 + weight_bytes

    out = pl.pallas_call(
        kernel,
        out_shape=jax.ShapeDtypeStruct((B_pad, L_pad), jnp.float32),
        grid=grid,
        in_specs=in_specs,
        out_specs=out_spec,
        compiler_params=pltpu.CompilerParams(
            # Batch tiles are independent -> shard grid steps across TCs on v7x.
            dimension_semantics=("parallel",),
        ),
        cost_estimate=pl.CostEstimate(
            flops=flops, transcendentals=0, bytes_accessed=bytes_accessed),
    )(z_p, p["w_in"], p["b_in"], p["wh"], p["bh"], p["w_out"], p["b_out"])

    return out[:B, :latent_size]


def mlp_decoder_reference(z, params, *, num_layers):
    """Pure-JAX reference mirroring the PyTorch forward."""
    h = z @ params["w_in"] + params["b_in"]
    h = jnp.where(h > 0, h, 0.2 * h)
    for l in range(num_layers - 1):
        h = h @ params["wh"][l] + params["bh"][l]
        h = jnp.where(h > 0, h, 0.2 * h)
    return h @ params["w_out"] + params["b_out"]


if __name__ == "__main__":
    latent_size, num_layers, hidden_dim = 8, 4, 64
    batch = 512  # 2 grid steps at b_tile=256 -> keeps both v7x TCs busy

    key = jax.random.PRNGKey(0)
    kz, kp = jax.random.split(key)
    z = jax.random.normal(kz, (batch, latent_size), jnp.float32)
    params = make_params(kp, latent_size, hidden_dim, num_layers)

    ref = mlp_decoder_reference(z, params, num_layers=num_layers)

    # f32 path: exact-ish vs reference.
    out = mlp_decoder_forward(z, params, latent_size=latent_size,
                              hidden_dim=hidden_dim, num_layers=num_layers,
                              b_tile=256, compute_dtype=jnp.float32)
    out = jax.block_until_ready(out)
    assert out.shape == (batch, latent_size)
    assert jnp.allclose(out, ref, atol=1e-5, rtol=1e-5), \
        "f32 kernel mismatch vs pure-JAX reference"

    # bf16-operand path (v6e/v7x MXU-native rate); f32 accumulation, looser tol.
    out_bf16 = mlp_decoder_forward(z, params, latent_size=latent_size,
                                   hidden_dim=hidden_dim,
                                   num_layers=num_layers,
                                   b_tile=256, compute_dtype=jnp.bfloat16)
    out_bf16 = jax.block_until_ready(out_bf16)
    assert jnp.allclose(out_bf16, ref, atol=1e-1, rtol=1e-1), \
        "bf16 kernel mismatch vs pure-JAX reference"

    print("KERNEL_OK")
</pallas_src>

<mosaic_0001>
module attributes {stable_mosaic.version = 11 : i64} {
  func.func @mlp_decoder_kernel(%arg0: i32, %arg1: memref<256x128xf32, #tpu.memory_space<vmem>>, %arg2: memref<128x128xf32, #tpu.memory_space<vmem>>, %arg3: memref<1x128xf32, #tpu.memory_space<vmem>>, %arg4: memref<3x128x128xf32, #tpu.memory_space<vmem>>, %arg5: memref<3x1x128xf32, #tpu.memory_space<vmem>>, %arg6: memref<128x128xf32, #tpu.memory_space<vmem>>, %arg7: memref<1x128xf32, #tpu.memory_space<vmem>>, %arg8: memref<256x128xf32, #tpu.memory_space<vmem>>) attributes {dimension_semantics = [#tpu.dimension_semantics<parallel>], iteration_bounds = array<i64: 2>, scalar_prefetch = 0 : i64, scratch_operands = 0 : i64, tpu.core_type = #tpu.core_type<tc>, window_params = [{transform_indices = @transform_0, window_bounds = array<i64: 256, 128>}, {pipeline_mode = #tpu.pipeline_mode<synchronous>, transform_indices = @transform_1, window_bounds = array<i64: 128, 128>}, {pipeline_mode = #tpu.pipeline_mode<synchronous>, transform_indices = @transform_2, window_bounds = array<i64: 1, 128>}, {pipeline_mode = #tpu.pipeline_mode<synchronous>, transform_indices = @transform_3, window_bounds = array<i64: 3, 128, 128>}, {pipeline_mode = #tpu.pipeline_mode<synchronous>, transform_indices = @transform_4, window_bounds = array<i64: 3, 1, 128>}, {pipeline_mode = #tpu.pipeline_mode<synchronous>, transform_indices = @transform_5, window_bounds = array<i64: 128, 128>}, {pipeline_mode = #tpu.pipeline_mode<synchronous>, transform_indices = @transform_6, window_bounds = array<i64: 1, 128>}, {transform_indices = @transform_7, window_bounds = array<i64: 256, 128>}]} {
    %c0 = arith.constant 0 : index
    %c0_0 = arith.constant 0 : index
    %0 = vector.load %arg1[%c0, %c0_0] : memref<256x128xf32, #tpu.memory_space<vmem>>, vector<256x128xf32>
    %c0_1 = arith.constant 0 : index
    %c0_2 = arith.constant 0 : index
    %1 = vector.load %arg2[%c0_1, %c0_2] : memref<128x128xf32, #tpu.memory_space<vmem>>, vector<128x128xf32>
    %cst = arith.constant dense<0.000000e+00> : vector<256x128xf32>
    %2 = tpu.matmul %0, %1, %cst {dimension_numbers = #tpu.dot_dimension_numbers<[1], [0], [0], [1], [0, 0, 1, 1], [], []>} : vector<256x128xf32>, vector<128x128xf32>, vector<256x128xf32> -> vector<256x128xf32>
    %c0_3 = arith.constant 0 : index
    %c0_4 = arith.constant 0 : index
    %3 = vector.load %arg3[%c0_3, %c0_4] : memref<1x128xf32, #tpu.memory_space<vmem>>, vector<1x128xf32>
    %4 = vector.broadcast %3 : vector<1x128xf32> to vector<256x128xf32>
    %5 = arith.addf %2, %4 : vector<256x128xf32>
    %cst_5 = arith.constant 2.000000e-01 : f32
    %6 = vector.broadcast %cst_5 : f32 to vector<256x128xf32>
    %7 = arith.mulf %6, %5 : vector<256x128xf32>
    %8 = arith.maximumf %5, %7 : vector<256x128xf32>
    %c0_6 = arith.constant 0 : index
    %c0_7 = arith.constant 0 : index
    %c0_8 = arith.constant 0 : index
    %9 = vector.load %arg4[%c0_6, %c0_7, %c0_8] : memref<3x128x128xf32, #tpu.memory_space<vmem>>, vector<1x128x128xf32>
    %10 = vector.shape_cast %9 : vector<1x128x128xf32> to vector<128x128xf32>
    %cst_9 = arith.constant dense<0.000000e+00> : vector<256x128xf32>
    %11 = tpu.matmul %8, %10, %cst_9 {dimension_numbers = #tpu.dot_dimension_numbers<[1], [0], [0], [1], [0, 0, 1, 1], [], []>} : vector<256x128xf32>, vector<128x128xf32>, vector<256x128xf32> -> vector<256x128xf32>
    %c0_10 = arith.constant 0 : index
    %c0_11 = arith.constant 0 : index
    %c0_12 = arith.constant 0 : index
    %12 = vector.load %arg5[%c0_10, %c0_11, %c0_12] : memref<3x1x128xf32, #tpu.memory_space<vmem>>, vector<1x1x128xf32>
    %13 = vector.shape_cast %12 : vector<1x1x128xf32> to vector<1x128xf32>
    %14 = vector.broadcast %13 : vector<1x128xf32> to vector<256x128xf32>
    %15 = arith.addf %11, %14 : vector<256x128xf32>
    %cst_13 = arith.constant 2.000000e-01 : f32
    %16 = vector.broadcast %cst_13 : f32 to vector<256x128xf32>
    %17 = arith.mulf %16, %15 : vector<256x128xf32>
    %18 = arith.maximumf %15, %17 : vector<256x128xf32>
    %c1 = arith.constant 1 : index
    %c0_14 = arith.constant 0 : index
    %c0_15 = arith.constant 0 : index
    %19 = vector.load %arg4[%c1, %c0_14, %c0_15] : memref<3x128x128xf32, #tpu.memory_space<vmem>>, vector<1x128x128xf32>
    %20 = vector.shape_cast %19 : vector<1x128x128xf32> to vector<128x128xf32>
    %cst_16 = arith.constant dense<0.000000e+00> : vector<256x128xf32>
    %21 = tpu.matmul %18, %20, %cst_16 {dimension_numbers = #tpu.dot_dimension_numbers<[1], [0], [0], [1], [0, 0, 1, 1], [], []>} : vector<256x128xf32>, vector<128x128xf32>, vector<256x128xf32> -> vector<256x128xf32>
    %c1_17 = arith.constant 1 : index
    %c0_18 = arith.constant 0 : index
    %c0_19 = arith.constant 0 : index
    %22 = vector.load %arg5[%c1_17, %c0_18, %c0_19] : memref<3x1x128xf32, #tpu.memory_space<vmem>>, vector<1x1x128xf32>
    %23 = vector.shape_cast %22 : vector<1x1x128xf32> to vector<1x128xf32>
    %24 = vector.broadcast %23 : vector<1x128xf32> to vector<256x128xf32>
    %25 = arith.addf %21, %24 : vector<256x128xf32>
    %cst_20 = arith.constant 2.000000e-01 : f32
    %26 = vector.broadcast %cst_20 : f32 to vector<256x128xf32>
    %27 = arith.mulf %26, %25 : vector<256x128xf32>
    %28 = arith.maximumf %25, %27 : vector<256x128xf32>
    %c2 = arith.constant 2 : index
    %c0_21 = arith.constant 0 : index
    %c0_22 = arith.constant 0 : index
    %29 = vector.load %arg4[%c2, %c0_21, %c0_22] : memref<3x128x128xf32, #tpu.memory_space<vmem>>, vector<1x128x128xf32>
    %30 = vector.shape_cast %29 : vector<1x128x128xf32> to vector<128x128xf32>
    %cst_23 = arith.constant dense<0.000000e+00> : vector<256x128xf32>
    %31 = tpu.matmul %28, %30, %cst_23 {dimension_numbers = #tpu.dot_dimension_numbers<[1], [0], [0], [1], [0, 0, 1, 1], [], []>} : vector<256x128xf32>, vector<128x128xf32>, vector<256x128xf32> -> vector<256x128xf32>
    %c2_24 = arith.constant 2 : index
    %c0_25 = arith.constant 0 : index
    %c0_26 = arith.constant 0 : index
    %32 = vector.load %arg5[%c2_24, %c0_25, %c0_26] : memref<3x1x128xf32, #tpu.memory_space<vmem>>, vector<1x1x128xf32>
    %33 = vector.shape_cast %32 : vector<1x1x128xf32> to vector<1x128xf32>
    %34 = vector.broadcast %33 : vector<1x128xf32> to vector<256x128xf32>
    %35 = arith.addf %31, %34 : vector<256x128xf32>
    %cst_27 = arith.constant 2.000000e-01 : f32
    %36 = vector.broadcast %cst_27 : f32 to vector<256x128xf32>
    %37 = arith.mulf %36, %35 : vector<256x128xf32>
    %38 = arith.maximumf %35, %37 : vector<256x128xf32>
    %c0_28 = arith.constant 0 : index
    %c0_29 = arith.constant 0 : index
    %39 = vector.load %arg6[%c0_28, %c0_29] : memref<128x128xf32, #tpu.memory_space<vmem>>, vector<128x128xf32>
    %cst_30 = arith.constant dense<0.000000e+00> : vector<256x128xf32>
    %40 = tpu.matmul %38, %39, %cst_30 {dimension_numbers = #tpu.dot_dimension_numbers<[1], [0], [0], [1], [0, 0, 1, 1], [], []>} : vector<256x128xf32>, vector<128x128xf32>, vector<256x128xf32> -> vector<256x128xf32>
    %c0_31 = arith.constant 0 : index
    %c0_32 = arith.constant 0 : index
    %41 = vector.load %arg7[%c0_31, %c0_32] : memref<1x128xf32, #tpu.memory_space<vmem>>, vector<1x128xf32>
    %42 = vector.broadcast %41 : vector<1x128xf32> to vector<256x128xf32>
    %43 = arith.addf %40, %42 : vector<256x128xf32>
    %c0_33 = arith.constant 0 : index
    %c0_34 = arith.constant 0 : index
    %44 = vector.load %arg8[%c0_33, %c0_34] : memref<256x128xf32, #tpu.memory_space<vmem>>, vector<256x128xf32>
    tpu.vector_store %arg8[%c0_33, %c0_34], %43 {strides = array<i32>} : memref<256x128xf32, #tpu.memory_space<vmem>>, vector<256x128xf32>,
    return
  }
  func.func @transform_0(%arg0: i32) -> (i32, i32) {
    %c0_i32 = arith.constant 0 : i32
    %c0_i32_0 = arith.constant 0 : i32
    return %arg0, %c0_i32 : i32, i32
  }
  func.func @transform_1(%arg0: i32) -> (i32, i32) {
    %c0_i32 = arith.constant 0 : i32
    %c0_i32_0 = arith.constant 0 : i32
    %c0_i32_1 = arith.constant 0 : i32
    return %c0_i32, %c0_i32_0 : i32, i32
  }
  func.func @transform_2(%arg0: i32) -> (i32, i32) {
    %c0_i32 = arith.constant 0 : i32
    %c0_i32_0 = arith.constant 0 : i32
    %c0_i32_1 = arith.constant 0 : i32
    return %c0_i32, %c0_i32_0 : i32, i32
  }
  func.func @transform_3(%arg0: i32) -> (i32, i32, i32) {
    %c0_i32 = arith.constant 0 : i32
    %c0_i32_0 = arith.constant 0 : i32
    %c0_i32_1 = arith.constant 0 : i32
    %c0_i32_2 = arith.constant 0 : i32
    return %c0_i32, %c0_i32_0, %c0_i32_1 : i32, i32, i32
  }
  func.func @transform_4(%arg0: i32) -> (i32, i32, i32) {
    %c0_i32 = arith.constant 0 : i32
    %c0_i32_0 = arith.constant 0 : i32
    %c0_i32_1 = arith.constant 0 : i32
    %c0_i32_2 = arith.constant 0 : i32
    return %c0_i32, %c0_i32_0, %c0_i32_1 : i32, i32, i32
  }
  func.func @transform_5(%arg0: i32) -> (i32, i32) {
    %c0_i32 = arith.constant 0 : i32
    %c0_i32_0 = arith.constant 0 : i32
    %c0_i32_1 = arith.constant 0 : i32
    return %c0_i32, %c0_i32_0 : i32, i32
  }
  func.func @transform_6(%arg0: i32) -> (i32, i32) {
    %c0_i32 = arith.constant 0 : i32
    %c0_i32_0 = arith.constant 0 : i32
    %c0_i32_1 = arith.constant 0 : i32
    return %c0_i32, %c0_i32_0 : i32, i32
  }
  func.func @transform_7(%arg0: i32) -> (i32, i32) {
    %c0_i32 = arith.constant 0 : i32
    %c0_i32_0 = arith.constant 0 : i32
    return %arg0, %c0_i32 : i32, i32
  }
}

</mosaic_0001>

<bundles_post_ra>
// kernel: tpu_custom_call.1
= control target key start
LH: loop header
LB: loop body
LE: loop exit
PB: predicated region body
PF: predicated region fallthrough
CT: control target
= control target key end

     0   :  { %s2355_s0 = inlined_call_operand.hbm [shape: f32[512,128], index: 0, kind: input, shape index: {}]   ;;  %s2356_s1 = inlined_call_operand.hbm [shape: f32[128,128], index: 1, kind: input, shape index: {}]   ;;  %s2357_s2 = inlined_call_operand.hbm [shape: f32[1,128], index: 2, kind: input, shape index: {}]   ;;  %s2358_s3 = inlined_call_operand.hbm [shape: f32[3,128,128], index: 3, kind: input, shape index: {}]   ;;  %s2359_s4 = inlined_call_operand.vmem [shape: f32[3,1,128], index: 4, kind: input, shape index: {}]   ;;  %s2360_s5 = inlined_call_operand.hbm [shape: f32[128,128], index: 5, kind: input, shape index: {}]   ;;  %s2361_s6 = inlined_call_operand.vmem [shape: f32[1,128], index: 6, kind: input, shape index: {}]   ;;  %s2362_s7 = inlined_call_operand.hbm [shape: f32[512,128], index: 7, kind: output, shape index: {}]  }
   0x1   :  { %2365 = sst [smem:[#allocation16_spill]] %s2356_s1 }
   0x2   :  { %12 = vsyncpa [#allocation3], 0 }
   0x3   :  { %14 = vsyncpa [#allocation3 + $0x1], 0 }
   0x4   :  { %15 = vsyncpa [#allocation6], 0 }
   0x5   :  { %16 = vsyncpa [#allocation9], 0 }
   0x6   :  { %17 = vsyncpa [#allocation4], 0 }
   0x7   :  { %19 = vsyncpa [#allocation4 + $0x1], 0  ;;  %s1925_s24 = smov 0   ;;  %s1927_s25 = smov 0  }
   0x8   :  { %s1929_s26 = smov 0   ;;  %s1931_s27 = smov 0  }
   0x9 LB: > { %s1946_s28 = sadd.s32 4294967295, %s1875_s27   ;;  %s1481_s29 = sadd.s32 4294967294, %s1875_s27   ;;  %s1875_s27 = sphi %s1931_s27, %s2379_s27   ;;  %s1871_s26 = sphi %s1929_s26, %s2378_s26   ;;  %s1867_s25 = sphi %s1927_s25, %s2377_s25   ;;  %s1863_s24 = sphi %s1925_s24, %s2376_s24  }
   0xa   : > { %p45_p0 = scmp.ne.s32.totalorder %s1867_s25, %s1863_s24  ;;  %p46_p1 = scmp.eq.s32.totalorder %s1946_s28, 0 }
   0xb   : > { %p195_p2 = scmp.eq.s32.totalorder %s1946_s28, 1  ;;  %p201_p3 = scmp.eq.s32.totalorder %s1481_s29, 1 }
   0xc   : > { %p1955_p4 = por %p46_p1, %p45_p0  ;;  %p1482_p5 = scmp.ge.s32.totalorder %s1875_s27, 1 }
   0xd   : > { %p1960_p6 = por %p201_p3, %p45_p0  ;;  %p208_p7 = scmp.lt.s32.totalorder %s1875_s27, 3 }
   0xe   : > { %s2368_s1 = sld [smem:[#allocation16_spill]]  ;;  %s1877_s13 = smov [#allocation5]  }
   0xf   : > { %p1968_p8 = pnand %p1482_p5, %p208_p7  ;;  %s221_s14 = sshll.u32 %s1877_s13, 4  ;;  %s222_s14 = int_to_ptr.vmem [resolvable:$true] %s221_s14 }
  0x10   : > { %s245_s18 = sshll.u32 %s2358_s3, 4  ;;  %s2363_s19 = smov 128   ;;  %s246_s18 = int_to_ptr.hbm [resolvable:$true] %s245_s18 }
  0x11   : > { %p1575_p9 = pneg %p1968_p8  ;;  %s2364_s20 = smov 8  }
  0x12   : > { %s1880_s21 = smov [#allocation8]   ;;  %s234_s9 = sshll.u32 %s2357_s2, 4  ;;  %s235_s9 = int_to_ptr.hbm [resolvable:$true] %s234_s9 }
  0x13   : > { %p1976_p10 = pnand %p1575_p9, %p46_p1  ;;  %s247_s22 = sshll.u32 %s1880_s21, 4  ;;  %s248_s22 = int_to_ptr.vmem [resolvable:$true] %s247_s22 }
  0x14   : > { %s219_s11 = sshll.u32 %s2368_s1, 4  ;;  %s262_s13 = sshll.u32 %s2360_s5, 4  ;;  %s220_s11 = int_to_ptr.hbm [resolvable:$true] %s219_s11  ;;  %s263_s13 = int_to_ptr.hbm [resolvable:$true] %s262_s13 }
  0x15   : > { %1578 = dma.hbm_to_vmem [thread:$0]  (!%p1976_p10), %s220_s11, 2048, %s222_s14, [#allocation6], %s2363_s19, %s2363_s19, %s2364_s20  }
  0x16   : > { %1584 = dma.hbm_to_vmem [thread:$0]  (!%p1976_p10), %s246_s18, 6144, %s248_s22, [#allocation9], %s2363_s19, %s2363_s19, %s2364_s20  }
  0x17   : > { %s1881_s14 = smov [#allocation7]   ;;  %s1882_s17 = smov [#allocation10]  }
  0x18   : > { %s236_s16 = sshll.u32 %s1881_s14, 4  ;;  %s264_s21 = sshll.u32 %s1882_s17, 4  ;;  %s237_s16 = int_to_ptr.vmem [resolvable:$true] %s236_s16  ;;  %s265_s21 = int_to_ptr.vmem [resolvable:$true] %s264_s21 }
  0x19   : > { %1581 = dma.hbm_to_vmem [thread:$0]  (!%p1976_p10), %s235_s9, 16, %s237_s16, [#allocation6]  }
  0x1a   : > { %1587 = dma.hbm_to_vmem [thread:$0]  (!%p1976_p10), %s263_s13, 2048, %s265_s21, [#allocation9], %s2363_s19, %s2363_s19, %s2364_s20  }
  0x1b   : > { %s2008_s18 = sadd.s32 1, %s1875_s27   ;;  %s32_s22 = sadd.s32 1, %s1871_s26 }
  0x1c   : > { %s29_s23 = ssub.s32 %s1875_s27, %s2008_s18  ;;  %p39_p12 = scmp.ne.s32.totalorder %s1871_s26, %s1867_s25 }
  0x1d   : > { %p30_p13 = scmp.eq.s32.totalorder %s29_s23, 0  ;;  %p40_p0 = scmp.eq.s32.totalorder %s1875_s27, 0 }
  0x1e   : > { %p2018_p3 = por %p195_p2, %p39_p12  ;;  %p1600_p5 = scmp.lt.s32.totalorder %s1875_s27, 2 }
  0x1f   : > { %s2024_s9 = scalar_select %p30_p13, %s1871_s26, %s32_s22  }
  0x20   : > { %p41_p7 = por %p40_p0, %p39_p12  ;;  %s281_s15 = sand.u32 1, %s1871_s26  }
  0x21   : > { %s1488_s10 = sshll.u32 %s281_s15, 8  ;;  %s1505_s11 = sshll.u32 %s1875_s27, 8 }
  0x22   : > { %s290_s16 = scalar_lea.hbm %s2355_s0, %s1505_s11  ;;  %s285_s17 = scalar_lea.vmem [#allocation2], %s1488_s10 }
  0x23   : > { %s293_s21 = sshll.u32 %s285_s17, 4  ;;  %s291_s23 = sshll.u32 %s290_s16, 4  ;;  %s294_s21 = int_to_ptr.vmem [resolvable:$true] %s293_s21  ;;  %s292_s23 = int_to_ptr.hbm [resolvable:$true] %s291_s23 }
  0x24   : > { %p2031_p2 = pnand %p1600_p5, %p41_p7  ;;  %s282_s22 = scalar_lea.sflag [#allocation3], %s281_s15 }
  0x25   : > { %s1771_s20 = sshra.s32 %s292_s23, 4  ;;  %s1778_s13 = scalar_lea.hbm %s2355_s0, 512  ;;  %s1772_s20 = int_to_ptr.hbm [resolvable:$true] %s1771_s20 }
  0x26   : > { %s1773_s1 = scalar_lea.hbm %s1772_s20, 256  ;;  %p1775_p10 = pneg %p2031_p2 }
  0x27   : > { %p1774_p9 = scmp.ne.s32.totalorder %s1772_s20, %s1773_s1  ;;  %p1779_p0 = scmp.lt.s32.totalorder %s1772_s20, %s2355_s0 }
  0x28   : > { %p1780_p5 = scmp.lt.s32.totalorder %s1778_s13, %s1773_s1 }
  0x29   : > { %p1776_p12 = pnand %p1775_p10, %p1774_p9 }
  0x2a   : > { %p1781_p7 = por %p1780_p5, %p1779_p0 }
  0x2b   : > { %p1777_p13 = pneg %p1776_p12 }
  0x2d   : > { %p1782_p11 = pnand %p1781_p7, %p1777_p13 }
  0x2f   : > { %1785 = shalt.err (!%p1782_p11)
}
  0x30   : > { %s2373_s15 = smov 8   ;;  %s2374_s17 = smov 128  }
  0x31   : > { %1591 = dma.hbm_to_vmem [thread:$0]  (!%p2031_p2), %s292_s23, 4096, %s294_s21, %s282_s22, %s2374_s17, %s2374_s17, %s2373_s15  }
  0x32   : > { %305 = sbr.rel (%p1968_p8) target bundleno = 1012 (0x3f4), region = 48  ;;  %s2051_s11 = sand.u32 (!%p1968_p8), 1, %s1867_s25  }
  0x33   : > { %s1492_s1 = sshll.u32 (!%p1968_p8), %s2051_s11, 8  ;;  %s308_s20 = scalar_lea.sflag (!%p1968_p8), [#allocation3], %s2051_s11 }
  0x34   : > { %s2057_s10 = scalar_lea.vmem (!%p1968_p8), [#allocation2], %s1492_s1 }
  0x37   : > { %1846 = dma.done.wait (%p1955_p4), %s308_s20, 4096  }
  0x38   : > { %1848 = vsyncadd (%p1955_p4), %s308_s20, 4294963200 }
  0x39   : > { %1850 = dma.done.wait (%p46_p1), [#allocation6], 2064  }
  0x3a   : > { %1852 = vsyncadd (%p46_p1), [#allocation6], 4294965232 }
  0x3b   : > { %1854 = dma.done.wait (%p46_p1), [#allocation9], 8192  }
  0x3c   : > { %1856 = vsyncadd (%p46_p1), [#allocation9], 4294959104  ;;  %v412_v0 = vld [vmem:[#allocation5 + $0x78] sm:$0xff]  ;;  %v411_v1 = vld [vmem:[#allocation5 + $0x70] sm:$0xff]  ;;  %s2241_s16 = scalar_lea.vmem [#allocation11], %s1492_s1  ;;  %s1506_s15 = sshll.u32 %s1946_s28, 8 }
  0x3d   : > { %417 = vmatpush.msra.mxu0 %v412_v0  ;;  %1507 = vmatpush.msra.mxu1 %v412_v0  ;;  %v410_v2 = vld [vmem:[#allocation5 + $0x68] sm:$0xff]  ;;  %v409_v3 = vld [vmem:[#allocation5 + $0x60] sm:$0xff]  ;;  %v408_v4 = vld [vmem:[#allocation5 + $0x58] sm:$0xff]  ;;  %s1366_s20 = scalar_lea.hbm %s2362_s7, %s1506_s15  ;;  %s1355_s12 = scalar_lea.sflag [#allocation4], %s2051_s11 }
  0x3e   : > { %1508 = vmatpush.msra.mxu2 %v412_v0  ;;  %1509 = vmatpush.msra.mxu3 %v412_v0  ;;  %v407_v5 = vld [vmem:[#allocation5 + $0x50] sm:$0xff]  ;;  %v406_v6 = vld [vmem:[#allocation5 + $0x48] sm:$0xff]  ;;  %v405_v7 = vld [vmem:[#allocation5 + $0x40] sm:$0xff]  ;;  %s1369_s30 = sshll.u32 %s1366_s20, 4  ;;  %s1821_s22 = scalar_lea.hbm %s2362_s7, 512  ;;  %s1370_s30 = int_to_ptr.hbm [resolvable:$true] %s1369_s30 }
  0x3f   : > { %418 = vmatpush.msra.mxu0 %v411_v1  ;;  %1510 = vmatpush.msra.mxu1 %v411_v1  ;;  %v404_v8 = vld [vmem:[#allocation5 + $0x38] sm:$0xff]  ;;  %v403_v9 = vld [vmem:[#allocation5 + $0x30] sm:$0xff]  ;;  %v402_v10 = vld [vmem:[#allocation5 + $0x28] sm:$0xff]  ;;  %s1815_s19 = sshra.s32 %s1370_s30, 4  ;;  %s1816_s19 = int_to_ptr.hbm [resolvable:$true] %s1815_s19 }
  0x40   : > { %1511 = vmatpush.msra.mxu2 %v411_v1  ;;  %1512 = vmatpush.msra.mxu3 %v411_v1  ;;  %v401_v11 = vld [vmem:[#allocation5 + $0x20] sm:$0xff]  ;;  %v400_v12 = vld [vmem:[#allocation5 + $0x18] sm:$0xff]  ;;  %v399_v13 = vld [vmem:[#allocation5 + $0x10] sm:$0xff]  ;;  %s1817_s28 = scalar_lea.hbm %s1816_s19, 256  ;;  %p1822_p11 = scmp.lt.s32.totalorder %s1816_s19, %s2362_s7 }
  0x41   : > { %419 = vmatpush.msra.mxu0 %v410_v2  ;;  %1513 = vmatpush.msra.mxu1 %v410_v2  ;;  %v398_v14 = vld [vmem:[#allocation5 + $0x8] sm:$0xff]  ;;  %v397_v15 = vld [vmem:[#allocation5] sm:$0xff]  ;;  %v367_v18 = vld [vmem:[%s2057_s10 + $0x10] sm:$0xff]  ;;  %p1818_p1 = scmp.ne.s32.totalorder %s1816_s19, %s1817_s28  ;;  %p1823_p2 = scmp.lt.s32.totalorder %s1821_s22, %s1817_s28 }
  0x42   : > { %1514 = vmatpush.msra.mxu2 %v410_v2  ;;  %1515 = vmatpush.msra.mxu3 %v410_v2  ;;  %v365_v16 = vld [vmem:[%s2057_s10] sm:$0xff]  ;;  %v366_v17 = vld [vmem:[%s2057_s10 + $0x8] sm:$0xff]  ;;  %v368_v19 = vld [vmem:[%s2057_s10 + $0x18] sm:$0xff] }
  0x43   : > { %420 = vmatpush.msra.mxu0 %v409_v3  ;;  %1516 = vmatpush.msra.mxu1 %v409_v3  ;;  %v373_v20 = vld [vmem:[%s2057_s10 + $0x40] sm:$0xff]  ;;  %v608_v22 = vld [vmem:[#allocation8 + $0x70] sm:$0xff]  ;;  %v607_v23 = vld [vmem:[#allocation8 + $0x68] sm:$0xff]  ;;  %p1819_p4 = pnand %p1818_p1, %p2018_p3  ;;  %p1824_p9 = por %p1823_p2, %p1822_p11 }
  0x44   : > { %1517 = vmatpush.msra.mxu2 %v409_v3  ;;  %1518 = vmatpush.msra.mxu3 %v409_v3  ;;  %v609_v21 = vld [vmem:[#allocation8 + $0x78] sm:$0xff]  ;;  %v606_v25 = vld [vmem:[#allocation8 + $0x60] sm:$0xff]  ;;  %v604_v28 = vld [vmem:[#allocation8 + $0x50] sm:$0xff] }
  0x45   : > { %421 = vmatpush.msra.mxu0 %v408_v4  ;;  %1519 = vmatpush.msra.mxu1 %v408_v4  ;;  %v369_v24 = vld [vmem:[%s2057_s10 + $0x20] sm:$0xff]  ;;  %v374_v26 = vld [vmem:[%s2057_s10 + $0x48] sm:$0xff]  ;;  %v375_v32 = vld [vmem:[%s2057_s10 + $0x50] sm:$0xff]  ;;  %p1820_p8 = pneg %p1819_p4 }
  0x46   : > { %1520 = vmatpush.msra.mxu2 %v408_v4  ;;  %1521 = vmatpush.msra.mxu3 %v408_v4  ;;  %v605_v27 = vld [vmem:[#allocation8 + $0x58] sm:$0xff]  ;;  %v603_v29 = vld [vmem:[#allocation8 + $0x48] sm:$0xff]  ;;  %v602_v31 = vld [vmem:[#allocation8 + $0x40] sm:$0xff] }
  0x47   : > { %422 = vmatpush.msra.mxu0 %v407_v5  ;;  %1522 = vmatpush.msra.mxu1 %v407_v5  ;;  %v370_v30 = vld [vmem:[%s2057_s10 + $0x28] sm:$0xff]  ;;  %v601_v33 = vld [vmem:[#allocation8 + $0x38] sm:$0xff]  ;;  %v600_v34 = vld [vmem:[#allocation8 + $0x30] sm:$0xff]  ;;  %p1825_p10 = pnand %p1824_p9, %p1820_p8 }
  0x48   : > { %1523 = vmatpush.msra.mxu2 %v407_v5  ;;  %1524 = vmatpush.msra.mxu3 %v407_v5  ;;  %v599_v35 = vld [vmem:[#allocation8 + $0x28] sm:$0xff]  ;;  %v598_v37 = vld [vmem:[#allocation8 + $0x20] sm:$0xff]  ;;  %v376_v38 = vld [vmem:[%s2057_s10 + $0x58] sm:$0xff] }
  0x49   : > { %423 = vmatpush.msra.mxu0 %v406_v6  ;;  %1525 = vmatpush.msra.mxu1 %v406_v6  ;;  %v371_v36 = vld [vmem:[%s2057_s10 + $0x30] sm:$0xff]  ;;  %v597_v39 = vld [vmem:[#allocation8 + $0x18] sm:$0xff]  ;;  %v378_v45 = vld [vmem:[%s2057_s10 + $0x68] sm:$0xff] }
  0x4a   : > { %1526 = vmatpush.msra.mxu2 %v406_v6  ;;  %1527 = vmatpush.msra.mxu3 %v406_v6  ;;  %v381_v40 = vld [vmem:[%s2057_s10 + $0x80] sm:$0xff]  ;;  %v596_v41 = vld [vmem:[#allocation8 + $0x10] sm:$0xff]  ;;  %v595_v42 = vld [vmem:[#allocation8 + $0x8] sm:$0xff] }
  0x4b   : > { %424 = vmatpush.msra.mxu0 %v405_v7  ;;  %1528 = vmatpush.msra.mxu1 %v405_v7  ;;  %v372_v43 = vld [vmem:[%s2057_s10 + $0x38] sm:$0xff]  ;;  %v377_v44 = vld [vmem:[%s2057_s10 + $0x60] sm:$0xff]  ;;  %v379_v46 = vld [vmem:[%s2057_s10 + $0x70] sm:$0xff] }
  0x4c   : > { %1529 = vmatpush.msra.mxu2 %v405_v7  ;;  %1530 = vmatpush.msra.mxu3 %v405_v7  ;;  %v380_v47 = vld [vmem:[%s2057_s10 + $0x78] sm:$0xff]  ;;  %v382_v48 = vld [vmem:[%s2057_s10 + $0x88] sm:$0xff]  ;;  %v383_v50 = vld [vmem:[%s2057_s10 + $0x90] sm:$0xff] }
  0x4d   : > { %425 = vmatpush.msra.mxu0 %v404_v8  ;;  %1531 = vmatpush.msra.mxu1 %v404_v8  ;;  %v594_v49 = vld [vmem:[#allocation8] sm:$0xff]  ;;  %v384_v51 = vld [vmem:[%s2057_s10 + $0x98] sm:$0xff]  ;;  %v2092_v53 = vld [vmem:[#allocation7] ss:$0 sm:$0xff] }
  0x4e   : > { %1532 = vmatpush.msra.mxu2 %v404_v8  ;;  %1533 = vmatpush.msra.mxu3 %v404_v8  ;;  %v385_v52 = vld [vmem:[%s2057_s10 + $0xa0] sm:$0xff]  ;;  %v386_v56 = vld [vmem:[%s2057_s10 + $0xa8] sm:$0xff]  ;;  %v387_v61 = vld [vmem:[%s2057_s10 + $0xb0] sm:$0xff] }
  0x4f   : > { %426 = vmatpush.msra.mxu0 %v403_v9  ;;  %1534 = vmatpush.msra.mxu1 %v403_v9  ;;  %v388_v2 = vld [vmem:[%s2057_s10 + $0xb8] sm:$0xff]  ;;  %v389_v7 = vld [vmem:[%s2057_s10 + $0xc0] sm:$0xff] }
  0x50   : > { %1535 = vmatpush.msra.mxu2 %v403_v9  ;;  %1536 = vmatpush.msra.mxu3 %v403_v9 }
  0x51   : > { %427 = vmatpush.msra.mxu0 %v402_v10  ;;  %1537 = vmatpush.msra.mxu1 %v402_v10 }
  0x52   : > { %1538 = vmatpush.msra.mxu2 %v402_v10  ;;  %1539 = vmatpush.msra.mxu3 %v402_v10  ;;  %v390_v10 = vld [vmem:[%s2057_s10 + $0xc8] sm:$0xff] }
  0x53   : > { %428 = vmatpush.msra.mxu0 %v401_v11  ;;  %1540 = vmatpush.msra.mxu1 %v401_v11 }
  0x54   : > { %1541 = vmatpush.msra.mxu2 %v401_v11  ;;  %1542 = vmatpush.msra.mxu3 %v401_v11 }
  0x55   : > { %429 = vmatpush.msra.mxu0 %v400_v12  ;;  %1543 = vmatpush.msra.mxu1 %v400_v12 }
  0x56   : > { %1544 = vmatpush.msra.mxu2 %v400_v12  ;;  %1545 = vmatpush.msra.mxu3 %v400_v12 }
  0x57   : > { %430 = vmatpush.msra.mxu0 %v399_v13  ;;  %1546 = vmatpush.msra.mxu1 %v399_v13 }
  0x58   : > { %1547 = vmatpush.msra.mxu2 %v399_v13  ;;  %1548 = vmatpush.msra.mxu3 %v399_v13 }
  0x59   : > { %431 = vmatpush.msra.mxu0 %v398_v14  ;;  %1549 = vmatpush.msra.mxu1 %v398_v14 }
  0x5a   : > { %1550 = vmatpush.msra.mxu2 %v398_v14  ;;  %1551 = vmatpush.msra.mxu3 %v398_v14 }
  0x5b   : > { %432 = vmatpush.msra.mxu0 %v397_v15  ;;  %1552 = vmatpush.msra.mxu1 %v397_v15 }
  0x5c   : > { %433 = vmatmul.f32.vlgmr.msra.gmra.mxu0 %v365_v16  ;;  %1553 = vmatpush.msra.mxu2 %v397_v15  ;;  %v807_v16 = vld [vmem:[#allocation8 + $0xf8] sm:$0xff] }
  0x5d   : > { %1554 = vmatpush.msra.mxu3 %v397_v15  ;;  %457 = vmatmul.f32.vlgmr.msra.gmra.mxu1 %v373_v20  ;;  %v391_v15 = vld [vmem:[%s2057_s10 + $0xd0] sm:$0xff] }
  0x5e   : > { %614 = vmatpush.msrb.mxu1 %v609_v21  ;;  %481 = vmatmul.f32.vlgmr.msra.gmra.mxu2 %v381_v40  ;;  %v801_v40 = vld [vmem:[#allocation8 + $0xc8] sm:$0xff] }
  0x5f   : > { %505 = vmatmul.f32.vlgmr.msra.gmra.mxu3 %v389_v7  ;;  %813 = vmatpush.msrb.mxu2 %v807_v16 }
  0x60   : > { %615 = vmatpush.msrb.mxu1 %v608_v22  ;;  %v806_v22 = vld [vmem:[#allocation8 + $0xf0] sm:$0xff] }
  0x61   : > { %814 = vmatpush.msrb.mxu2 %v806_v22 }
  0x62   : > { %616 = vmatpush.msrb.mxu1 %v607_v23  ;;  %v392_v23 = vld [vmem:[%s2057_s10 + $0xd8] sm:$0xff] }
  0x64   : > { %436 = vmatmul.f32.gmra.mxu0 %v366_v17  ;;  %617 = vmatpush.msrb.mxu1 %v606_v25 }
  0x65   : > { %460 = vmatmul.f32.gmra.mxu1 %v374_v26 }
  0x66   : > { %618 = vmatpush.msrb.mxu1 %v605_v27  ;;  %484 = vmatmul.f32.gmra.mxu2 %v382_v48 }
  0x67   : > { %508 = vmatmul.f32.gmra.mxu3 %v390_v10 }
  0x68   : > { %619 = vmatpush.msrb.mxu1 %v604_v28 }
  0x6a   : > { %620 = vmatpush.msrb.mxu1 %v603_v29 }
  0x6c   : > { %439 = vmatmul.f32.gmra.mxu0 %v367_v18  ;;  %621 = vmatpush.msrb.mxu1 %v602_v31  ;;  %v393_v31 = vld [vmem:[%s2057_s10 + $0xe0] sm:$0xff] }
  0x6d   : > { %463 = vmatmul.f32.gmra.mxu1 %v375_v32  ;;  %v803_v32 = vld [vmem:[#allocation8 + $0xd8] sm:$0xff] }
  0x6e   : > { %622 = vmatpush.msrb.mxu1 %v601_v33  ;;  %487 = vmatmul.f32.gmra.mxu2 %v383_v50 }
  0x6f   : > { %511 = vmatmul.f32.gmra.mxu3 %v391_v15 }
  0x70   : > { %623 = vmatpush.msrb.mxu1 %v600_v34 }
  0x72   : > { %624 = vmatpush.msrb.mxu1 %v599_v35 }
  0x74   : > { %442 = vmatmul.f32.gmra.mxu0 %v368_v19  ;;  %625 = vmatpush.msrb.mxu1 %v598_v37 }
  0x75   : > { %466 = vmatmul.f32.gmra.mxu1 %v376_v38  ;;  %v802_v38 = vld [vmem:[#allocation8 + $0xd0] sm:$0xff] }
  0x76   : > { %626 = vmatpush.msrb.mxu1 %v597_v39  ;;  %490 = vmatmul.f32.gmra.mxu2 %v384_v51  ;;  %v394_v39 = vld [vmem:[%s2057_s10 + $0xe8] sm:$0xff] }
  0x77   : > { %514 = vmatmul.f32.gmra.mxu3 %v392_v23  ;;  %v2125_v23 = vld [vmem:[%s2359_s4] ss:$0 sm:$0xff] }
  0x78   : > { %627 = vmatpush.msrb.mxu1 %v596_v41 }
  0x7a   : > { %628 = vmatpush.msrb.mxu1 %v595_v42 }
  0x7c   : > { %445 = vmatmul.f32.gmra.mxu0 %v369_v24  ;;  %629 = vmatpush.msrb.mxu1 %v594_v49  ;;  %v805_v24 = vld [vmem:[#allocation8 + $0xe8] sm:$0xff] }
  0x7d   : > { %469 = vmatmul.f32.gmra.mxu1 %v377_v44  ;;  %815 = vmatpush.msrb.mxu2 %v805_v24 }
  0x7e   : > { %493 = vmatmul.f32.gmra.mxu2 %v385_v52  ;;  %v798_v52 = vld [vmem:[#allocation8 + $0xb0] sm:$0xff] }
  0x7f   : > { %517 = vmatmul.f32.gmra.mxu3 %v393_v31 }
  0x84   : > { %448 = vmatmul.f32.gmra.mxu0 %v370_v30  ;;  %v804_v30 = vld [vmem:[#allocation8 + $0xe0] sm:$0xff] }
  0x85   : > { %472 = vmatmul.f32.gmra.mxu1 %v378_v45  ;;  %816 = vmatpush.msrb.mxu2 %v804_v30  ;;  %v800_v45 = vld [vmem:[#allocation8 + $0xc0] sm:$0xff] }
  0x86   : > { %496 = vmatmul.f32.gmra.mxu2 %v386_v56 }
  0x87   : > { %817 = vmatpush.msrb.mxu2 %v803_v32  ;;  %520 = vmatmul.f32.gmra.mxu3 %v394_v39 }
  0x89   : > { %818 = vmatpush.msrb.mxu2 %v802_v38 }
  0x8b   : > { %819 = vmatpush.msrb.mxu2 %v801_v40 }
  0x8c   : > { %451 = vmatmul.f32.gmra.mxu0 %v371_v36 }
  0x8d   : > { %475 = vmatmul.f32.gmra.mxu1 %v379_v46  ;;  %v395_v46 = vld [vmem:[%s2057_s10 + $0xf0] sm:$0xff]  ;;  %820 = vmatpush.msrb.mxu2 %v800_v45 }
  0x8e   : > { %499 = vmatmul.f32.gmra.mxu2 %v387_v61  ;;  %v795_v61 = vld [vmem:[#allocation8 + $0x98] sm:$0xff] }
  0x8f   : > { %523 = vmatmul.f32.gmra.mxu3 %v395_v46 }
  0x94   : > { %454 = vmatmul.f32.gmra.mxu0 %v372_v43 }
  0x95   : > { %478 = vmatmul.f32.gmra.mxu1 %v380_v47  ;;  %v799_v47 = vld [vmem:[#allocation8 + $0xb8] sm:$0xff] }
  0x96   : > { %502 = vmatmul.f32.gmra.mxu2 %v388_v2  ;;  %v794_v2 = vld [vmem:[#allocation8 + $0x90] sm:$0xff] }
  0x97   : > { %821 = vmatpush.msrb.mxu2 %v799_v47 }
  0x99   : > { %822 = vmatpush.msrb.mxu2 %v798_v52 }
  0xd9   : > { %v434_v54 = vpop.f32.mrf.mxu0 }
  0xda   : > { %v435_v55 = vadd.f32 %v2092_v53, %v434_v54  ;;  %v458_v20 = vpop.f32.mrf.mxu1  ;;  %v396_v54 = vld [vmem:[%s2057_s10 + $0xf8] sm:$0xff]  ;;  %s1367_s10 = sshll.u32 %s2241_s16, 4  ;;  %s1368_s10 = int_to_ptr.vmem [resolvable:$true] %s1367_s10 }
  0xdb   : > { %v459_v36 = vadd.f32 %v2092_v53, %v458_v20  ;;  %526 = vmatmul.f32.gmra.mxu3 %v396_v54 }
  0xdc   : > { %v530_v57 = vmul.f32 0.2, %v435_v55 }
  0xdd   : > { %v538_v42 = vmul.f32 0.2, %v459_v36 }
  0xde   : > { %v562_v58 = vmax.f32 %v435_v55, %v530_v57  ;;  %v797_v55 = vld [vmem:[#allocation8 + $0xa8] sm:$0xff] }
  0xdf   : > { %v570_v44 = vmax.f32 %v459_v36, %v538_v42  ;;  %823 = vmatpush.msrb.mxu2 %v797_v55 }
  0xe0   : > { %630 = vmatmul.f32.vlgmr.msrb.gmra.mxu1 %v562_v58 }
  0xe1   : > { %v437_v59 = vpop.f32.mrf.mxu0  ;;  %v482_v10 = vpop.f32.mrf.mxu2 }
  0xe2   : > { %v438_v60 = vadd.f32 %v2092_v53, %v437_v59  ;;  %v461_v29 = vpop.f32.mrf.mxu1 }
  0xe3   : > { %v462_v43 = vadd.f32 %v2092_v53, %v461_v29 }
  0xe4   : > { %v531_v62 = vmul.f32 0.2, %v438_v60 }
  0xe5   : > { %v539_v48 = vmul.f32 0.2, %v462_v43 }
  0xe6   : > { %v563_v63 = vmax.f32 %v438_v60, %v531_v62  ;;  %v796_v60 = vld [vmem:[#allocation8 + $0xa0] sm:$0xff] }
  0xe7   : > { %v571_v51 = vmax.f32 %v462_v43, %v539_v48  ;;  %824 = vmatpush.msrb.mxu2 %v796_v60 }
  0xe8   : > { %633 = vmatmul.f32.gmra.mxu1 %v563_v63 }
  0xe9   : > { %v440_v0 = vpop.f32.mrf.mxu0  ;;  %825 = vmatpush.msrb.mxu2 %v795_v61 }
  0xea   : > { %v441_v1 = vadd.f32 %v2092_v53, %v440_v0  ;;  %v464_v41 = vpop.f32.mrf.mxu1 }
  0xeb   : > { %v465_v50 = vadd.f32 %v2092_v53, %v464_v41  ;;  %826 = vmatpush.msrb.mxu2 %v794_v2 }
  0xec   : > { %v532_v3 = vmul.f32 0.2, %v441_v1 }
  0xed   : > { %v540_v56 = vmul.f32 0.2, %v465_v50 }
  0xee   : > { %v564_v4 = vmax.f32 %v441_v1, %v532_v3  ;;  %v793_v3 = vld [vmem:[#allocation8 + $0x88] sm:$0xff] }
  0xef   : > { %v572_v59 = vmax.f32 %v465_v50, %v540_v56  ;;  %827 = vmatpush.msrb.mxu2 %v793_v3 }
  0xf0   : > { %636 = vmatmul.f32.gmra.mxu1 %v564_v4 }
  0xf1   : > { %v443_v5 = vpop.f32.mrf.mxu0 }
  0xf2   : > { %v444_v6 = vadd.f32 %v2092_v53, %v443_v5  ;;  %v467_v49 = vpop.f32.mrf.mxu1 }
  0xf3   : > { %v468_v58 = vadd.f32 %v2092_v53, %v467_v49 }
  0xf4   : > { %v533_v8 = vmul.f32 0.2, %v444_v6 }
  0xf5   : > { %v541_v62 = vmul.f32 0.2, %v468_v58 }
  0xf6   : > { %v565_v9 = vmax.f32 %v444_v6, %v533_v8 }
  0xf7   : > { %v573_v0 = vmax.f32 %v468_v58, %v541_v62 }
  0xf8   : > { %639 = vmatmul.f32.gmra.mxu1 %v565_v9  ;;  %v792_v9 = vld [vmem:[#allocation8 + $0x80] sm:$0xff] }
  0xf9   : > { %v446_v11 = vpop.f32.mrf.mxu0  ;;  %828 = vmatpush.msrb.mxu2 %v792_v9 }
  0xfa   : > { %v447_v12 = vadd.f32 %v2092_v53, %v446_v11  ;;  %v470_v57 = vpop.f32.mrf.mxu1 }
  0xfb   : > { %v471_v63 = vadd.f32 %v2092_v53, %v470_v57 }
  0xfc   : > { %v534_v13 = vmul.f32 0.2, %v447_v12 }
  0xfd   : > { %v542_v4 = vmul.f32 0.2, %v471_v63 }
  0xfe   : > { %v566_v14 = vmax.f32 %v447_v12, %v534_v13 }
  0xff   : > { %v574_v6 = vmax.f32 %v471_v63, %v542_v4 }
 0x100   : > { %642 = vmatmul.f32.gmra.mxu1 %v566_v14 }
 0x101   : > { %v449_v17 = vpop.f32.mrf.mxu0 }
 0x102   : > { %v450_v18 = vadd.f32 %v2092_v53, %v449_v17  ;;  %v473_v1 = vpop.f32.mrf.mxu1  ;;  %v485_v17 = vpop.f32.mrf.mxu2 }
 0x103   : > { %v474_v5 = vadd.f32 %v2092_v53, %v473_v1  ;;  %v506_v1 = vpop.f32.mrf.mxu3 }
 0x104   : > { %v535_v19 = vmul.f32 0.2, %v450_v18 }
 0x105   : > { %v543_v8 = vmul.f32 0.2, %v474_v5 }
 0x106   : > { %v567_v21 = vmax.f32 %v450_v18, %v535_v19  ;;  %v483_v19 = vadd.f32 %v2092_v53, %v482_v10 }
 0x107   : > { %v575_v12 = vmax.f32 %v474_v5, %v543_v8 }
 0x108   : > { %645 = vmatmul.f32.gmra.mxu1 %v567_v21  ;;  %v546_v22 = vmul.f32 0.2, %v483_v19 }
 0x109   : > { %v452_v25 = vpop.f32.mrf.mxu0 }
 0x10a   : > { %v453_v26 = vadd.f32 %v2092_v53, %v452_v25  ;;  %v476_v7 = vpop.f32.mrf.mxu1  ;;  %v488_v21 = vpop.f32.mrf.mxu2  ;;  %v578_v25 = vmax.f32 %v483_v19, %v546_v22  ;;  %v507_v22 = vadd.f32 %v2092_v53, %v506_v1 }
 0x10b   : > { %v477_v11 = vadd.f32 %v2092_v53, %v476_v7 }
 0x10c   : > { %v536_v27 = vmul.f32 0.2, %v453_v26 }
 0x10d   : > { %v544_v13 = vmul.f32 0.2, %v477_v11 }
 0x10e   : > { %v568_v28 = vmax.f32 %v453_v26, %v536_v27  ;;  %v486_v27 = vadd.f32 %v2092_v53, %v485_v17 }
 0x10f   : > { %v576_v16 = vmax.f32 %v477_v11, %v544_v13  ;;  %v509_v13 = vpop.f32.mrf.mxu3 }
 0x110   : > { %648 = vmatmul.f32.gmra.mxu1 %v568_v28  ;;  %v547_v30 = vmul.f32 0.2, %v486_v27 }
 0x111   : > { %v455_v33 = vpop.f32.mrf.mxu0 }
 0x112   : > { %v456_v34 = vadd.f32 %v2092_v53, %v455_v33  ;;  %v479_v14 = vpop.f32.mrf.mxu1  ;;  %v491_v31 = vpop.f32.mrf.mxu2  ;;  %v579_v33 = vmax.f32 %v486_v27, %v547_v30 }
 0x113   : > { %v480_v15 = vadd.f32 %v2092_v53, %v479_v14  ;;  %v492_v43 = vadd.f32 %v2092_v53, %v491_v31 }
 0x114   : > { %v537_v35 = vmul.f32 0.2, %v456_v34 }
 0x115   : > { %v545_v18 = vmul.f32 0.2, %v480_v15  ;;  %v549_v45 = vmul.f32 0.2, %v492_v43 }
 0x116   : > { %v569_v37 = vmax.f32 %v456_v34, %v537_v35  ;;  %v489_v35 = vadd.f32 %v2092_v53, %v488_v21 }
 0x117   : > { %v577_v20 = vmax.f32 %v480_v15, %v545_v18  ;;  %v581_v48 = vmax.f32 %v492_v43, %v549_v45  ;;  %v1006_v15 = vld [vmem:[#allocation8 + $0x178] sm:$0xff]  ;;  %v512_v27 = vpop.f32.mrf.mxu3  ;;  %v1000_v45 = vld [vmem:[#allocation8 + $0x148] sm:$0xff] }
 0x118   : > { %651 = vmatmul.f32.gmra.mxu1 %v569_v37  ;;  %v548_v37 = vmul.f32 0.2, %v489_v35  ;;  %1012 = vmatpush.msrb.mxu3 %v1006_v15  ;;  %v513_v43 = vadd.f32 %v2092_v53, %v512_v27  ;;  %v993_v15 = vld [vmem:[#allocation8 + $0x110] sm:$0xff] }
 0x11a   : > { %v494_v40 = vpop.f32.mrf.mxu2  ;;  %v580_v41 = vmax.f32 %v489_v35, %v548_v37  ;;  %v1002_v35 = vld [vmem:[#allocation8 + $0x158] sm:$0xff] }
 0x11b   : > { %v495_v50 = vadd.f32 %v2092_v53, %v494_v40 }
 0x11d   : > { %v550_v54 = vmul.f32 0.2, %v495_v50 }
 0x11f   : > { %v582_v57 = vmax.f32 %v495_v50, %v550_v54 }
 0x120   : > { %654 = vmatmul.f32.gmra.mxu1 %v570_v44 }
 0x128   : > { %657 = vmatmul.f32.gmra.mxu1 %v571_v51  ;;  %v497_v51 = vpop.f32.mrf.mxu2 }
 0x130   : > { %660 = vmatmul.f32.gmra.mxu1 %v572_v59  ;;  %v498_v59 = vadd.f32 %v2092_v53, %v497_v51  ;;  %v500_v61 = vpop.f32.mrf.mxu2 }
 0x131   : > { %v501_v4 = vadd.f32 %v2092_v53, %v500_v61 }
 0x132   : > { %v551_v62 = vmul.f32 0.2, %v498_v59 }
 0x134   : > { %v583_v2 = vmax.f32 %v498_v59, %v551_v62 }
 0x138   : > { %663 = vmatmul.f32.gmra.mxu1 %v573_v0  ;;  %v503_v8 = vpop.f32.mrf.mxu2 }
 0x140   : > { %666 = vmatmul.f32.gmra.mxu1 %v574_v6  ;;  %v552_v6 = vmul.f32 0.2, %v501_v4 }
 0x142   : > { %v584_v10 = vmax.f32 %v501_v4, %v552_v6 }
 0x148   : > { %669 = vmatmul.f32.gmra.mxu1 %v575_v12  ;;  %v504_v12 = vadd.f32 %v2092_v53, %v503_v8 }
 0x14a   : > { %v553_v17 = vmul.f32 0.2, %v504_v12 }
 0x150   : > { %672 = vmatmul.f32.gmra.mxu1 %v576_v16  ;;  %v1005_v16 = vld [vmem:[#allocation8 + $0x170] sm:$0xff] }
 0x151   : > { %1013 = vmatpush.msrb.mxu3 %v1005_v16 }
 0x158   : > { %675 = vmatmul.f32.gmra.mxu1 %v577_v20  ;;  %v585_v20 = vmax.f32 %v504_v12, %v553_v17 }
 0x15d   : > { %v631_v24 = vpop.f32.mrf.mxu1 }
 0x15e   : > { %v632_v26 = vadd.f32 %v2125_v23, %v631_v24 }
 0x160   : > { %v727_v28 = vmul.f32 0.2, %v632_v26  ;;  %678 = vmatmul.f32.gmra.mxu1 %v578_v25  ;;  %v1004_v25 = vld [vmem:[#allocation8 + $0x168] sm:$0xff] }
 0x161   : > { %1014 = vmatpush.msrb.mxu3 %v1004_v25 }
 0x162   : > { %v759_v29 = vmax.f32 %v632_v26, %v727_v28  ;;  %v1003_v26 = vld [vmem:[#allocation8 + $0x160] sm:$0xff]  ;;  %v554_v28 = vmul.f32 0.2, %v507_v22 }
 0x163   : > { %1015 = vmatpush.msrb.mxu3 %v1003_v26  ;;  %v991_v26 = vld [vmem:[#allocation8 + $0x100] sm:$0xff] }
 0x164   : > { %829 = vmatmul.f32.vlgmr.msrb.gmra.mxu2 %v759_v29  ;;  %v586_v31 = vmax.f32 %v507_v22, %v554_v28 }
 0x165   : > { %v634_v32 = vpop.f32.mrf.mxu1  ;;  %1016 = vmatpush.msrb.mxu3 %v1002_v35 }
 0x166   : > { %v635_v34 = vadd.f32 %v2125_v23, %v634_v32 }
 0x168   : > { %681 = vmatmul.f32.gmra.mxu1 %v579_v33  ;;  %v728_v36 = vmul.f32 0.2, %v635_v34  ;;  %v510_v33 = vadd.f32 %v2092_v53, %v509_v13 }
 0x16a   : > { %v760_v38 = vmax.f32 %v635_v34, %v728_v36  ;;  %v1001_v36 = vld [vmem:[#allocation8 + $0x150] sm:$0xff]  ;;  %v555_v37 = vmul.f32 0.2, %v510_v33 }
 0x16b   : > { %1017 = vmatpush.msrb.mxu3 %v1001_v36 }
 0x16c   : > { %832 = vmatmul.f32.gmra.mxu2 %v760_v38 }
 0x16d   : > { %v637_v39 = vpop.f32.mrf.mxu1  ;;  %1018 = vmatpush.msrb.mxu3 %v1000_v45 }
 0x16e   : > { %v638_v42 = vadd.f32 %v2125_v23, %v637_v39  ;;  %v515_v39 = vpop.f32.mrf.mxu3 }
 0x16f   : > { %v516_v54 = vadd.f32 %v2092_v53, %v515_v39 }
 0x170   : > { %684 = vmatmul.f32.gmra.mxu1 %v580_v41  ;;  %v729_v44 = vmul.f32 0.2, %v638_v42  ;;  %v587_v41 = vmax.f32 %v510_v33, %v555_v37 }
 0x172   : > { %v761_v46 = vmax.f32 %v638_v42, %v729_v44 }
 0x174   : > { %835 = vmatmul.f32.gmra.mxu2 %v761_v46  ;;  %v999_v46 = vld [vmem:[#allocation8 + $0x140] sm:$0xff] }
 0x175   : > { %v640_v47 = vpop.f32.mrf.mxu1  ;;  %1019 = vmatpush.msrb.mxu3 %v999_v46 }
 0x176   : > { %v641_v49 = vadd.f32 %v2125_v23, %v640_v47  ;;  %v556_v47 = vmul.f32 0.2, %v513_v43  ;;  %v518_v50 = vpop.f32.mrf.mxu3 }
 0x178   : > { %687 = vmatmul.f32.gmra.mxu1 %v581_v48  ;;  %v730_v52 = vmul.f32 0.2, %v641_v49  ;;  %v588_v51 = vmax.f32 %v513_v43, %v556_v47 }
 0x17a   : > { %v762_v55 = vmax.f32 %v641_v49, %v730_v52 }
 0x17c   : > { %838 = vmatmul.f32.gmra.mxu2 %v762_v55 }
 0x17d   : > { %v643_v56 = vpop.f32.mrf.mxu1 }
 0x17e   : > { %v644_v58 = vadd.f32 %v2125_v23, %v643_v56  ;;  %v998_v56 = vld [vmem:[#allocation8 + $0x138] sm:$0xff] }
 0x17f   : > { %1020 = vmatpush.msrb.mxu3 %v998_v56 }
 0x180   : > { %690 = vmatmul.f32.gmra.mxu1 %v582_v57  ;;  %v731_v60 = vmul.f32 0.2, %v644_v58  ;;  %v997_v57 = vld [vmem:[#allocation8 + $0x130] sm:$0xff] }
 0x181   : > { %1021 = vmatpush.msrb.mxu3 %v997_v57 }
 0x182   : > { %v763_v63 = vmax.f32 %v644_v58, %v731_v60  ;;  %v557_v58 = vmul.f32 0.2, %v516_v54 }
 0x184   : > { %841 = vmatmul.f32.gmra.mxu2 %v763_v63  ;;  %v589_v61 = vmax.f32 %v516_v54, %v557_v58  ;;  %v519_v63 = vadd.f32 %v2092_v53, %v518_v50 }
 0x185   : > { %v646_v0 = vpop.f32.mrf.mxu1 }
 0x186   : > { %v647_v3 = vadd.f32 %v2125_v23, %v646_v0  ;;  %v521_v0 = vpop.f32.mrf.mxu3  ;;  %v558_v4 = vmul.f32 0.2, %v519_v63 }
 0x188   : > { %693 = vmatmul.f32.gmra.mxu1 %v583_v2  ;;  %v732_v5 = vmul.f32 0.2, %v647_v3  ;;  %v996_v2 = vld [vmem:[#allocation8 + $0x128] sm:$0xff] }
 0x189   : > { %1022 = vmatpush.msrb.mxu3 %v996_v2 }
 0x18a   : > { %v764_v7 = vmax.f32 %v647_v3, %v732_v5  ;;  %v995_v3 = vld [vmem:[#allocation8 + $0x120] sm:$0xff] }
 0x18b   : > { %1023 = vmatpush.msrb.mxu3 %v995_v3 }
 0x18c   : > { %844 = vmatmul.f32.gmra.mxu2 %v764_v7  ;;  %v590_v7 = vmax.f32 %v519_v63, %v558_v4 }
 0x18d   : > { %v649_v9 = vpop.f32.mrf.mxu1 }
 0x18e   : > { %v650_v11 = vadd.f32 %v2125_v23, %v649_v9  ;;  %v522_v9 = vadd.f32 %v2092_v53, %v521_v0 }
 0x190   : > { %696 = vmatmul.f32.gmra.mxu1 %v584_v10  ;;  %v733_v14 = vmul.f32 0.2, %v650_v11  ;;  %v559_v12 = vmul.f32 0.2, %v522_v9 }
 0x192   : > { %v765_v18 = vmax.f32 %v650_v11, %v733_v14  ;;  %v524_v11 = vpop.f32.mrf.mxu3  ;;  %v994_v14 = vld [vmem:[#allocation8 + $0x118] sm:$0xff]  ;;  %v591_v17 = vmax.f32 %v522_v9, %v559_v12 }
 0x193   : > { %1024 = vmatpush.msrb.mxu3 %v994_v14 }
 0x194   : > { %847 = vmatmul.f32.gmra.mxu2 %v765_v18 }
 0x195   : > { %v652_v19 = vpop.f32.mrf.mxu1  ;;  %1025 = vmatpush.msrb.mxu3 %v993_v15 }
 0x196   : > { %v653_v21 = vadd.f32 %v2125_v23, %v652_v19  ;;  %v525_v19 = vadd.f32 %v2092_v53, %v524_v11 }
 0x198   : > { %699 = vmatmul.f32.gmra.mxu1 %v585_v20  ;;  %v734_v24 = vmul.f32 0.2, %v653_v21 }
 0x19a   : > { %v766_v29 = vmax.f32 %v653_v21, %v734_v24  ;;  %v560_v21 = vmul.f32 0.2, %v525_v19  ;;  %v992_v24 = vld [vmem:[#allocation8 + $0x108] sm:$0xff]  ;;  %v527_v25 = vpop.f32.mrf.mxu3 }
 0x19b   : > { %1026 = vmatpush.msrb.mxu3 %v992_v24 }
 0x19c   : > { %850 = vmatmul.f32.gmra.mxu2 %v766_v29  ;;  %v592_v28 = vmax.f32 %v525_v19, %v560_v21 }
 0x19d   : > { %v655_v30 = vpop.f32.mrf.mxu1  ;;  %1027 = vmatpush.msrb.mxu3 %v991_v26 }
 0x19e   : > { %v656_v32 = vadd.f32 %v2125_v23, %v655_v30  ;;  %v528_v30 = vadd.f32 %v2092_v53, %v527_v25  ;;  %v2162_v53 = vld [vmem:[%s2359_s4 + $0x1] ss:$0 sm:$0xff] }
 0x1a0   : > { %v735_v34 = vmul.f32 0.2, %v656_v32  ;;  %702 = vmatmul.f32.gmra.mxu1 %v586_v31 }
 0x1a2   : > { %v767_v38 = vmax.f32 %v656_v32, %v735_v34  ;;  %v561_v32 = vmul.f32 0.2, %v528_v30 }
 0x1a4   : > { %853 = vmatmul.f32.gmra.mxu2 %v767_v38  ;;  %v593_v35 = vmax.f32 %v528_v30, %v561_v32 }
 0x1a5   : > { %v658_v40 = vpop.f32.mrf.mxu1 }
 0x1a6   : > { %v659_v42 = vadd.f32 %v2125_v23, %v658_v40 }
 0x1a8   : > { %v736_v44 = vmul.f32 0.2, %v659_v42  ;;  %705 = vmatmul.f32.gmra.mxu1 %v587_v41 }
 0x1aa   : > { %v768_v48 = vmax.f32 %v659_v42, %v736_v44 }
 0x1ac   : > { %856 = vmatmul.f32.gmra.mxu2 %v768_v48 }
 0x1ad   : > { %v661_v49 = vpop.f32.mrf.mxu1 }
 0x1ae   : > { %v662_v52 = vadd.f32 %v2125_v23, %v661_v49 }
 0x1b0   : > { %v737_v55 = vmul.f32 0.2, %v662_v52  ;;  %708 = vmatmul.f32.gmra.mxu1 %v588_v51 }
 0x1b2   : > { %v769_v59 = vmax.f32 %v662_v52, %v737_v55 }
 0x1b4   : > { %859 = vmatmul.f32.gmra.mxu2 %v769_v59 }
 0x1b5   : > { %v664_v60 = vpop.f32.mrf.mxu1 }
 0x1b6   : > { %v665_v62 = vadd.f32 %v2125_v23, %v664_v60 }
 0x1b8   : > { %v738_v1 = vmul.f32 0.2, %v665_v62  ;;  %711 = vmatmul.f32.gmra.mxu1 %v589_v61 }
 0x1ba   : > { %v770_v5 = vmax.f32 %v665_v62, %v738_v1 }
 0x1bc   : > { %862 = vmatmul.f32.gmra.mxu2 %v770_v5 }
 0x1bd   : > { %v667_v6 = vpop.f32.mrf.mxu1 }
 0x1be   : > { %v668_v8 = vadd.f32 %v2125_v23, %v667_v6 }
 0x1c0   : > { %v739_v10 = vmul.f32 0.2, %v668_v8  ;;  %714 = vmatmul.f32.gmra.mxu1 %v590_v7 }
 0x1c2   : > { %v771_v13 = vmax.f32 %v668_v8, %v739_v10 }
 0x1c4   : > { %865 = vmatmul.f32.gmra.mxu2 %v771_v13 }
 0x1c5   : > { %v670_v16 = vpop.f32.mrf.mxu1 }
 0x1c6   : > { %v671_v18 = vadd.f32 %v2125_v23, %v670_v16 }
 0x1c8   : > { %v740_v20 = vmul.f32 0.2, %v671_v18  ;;  %717 = vmatmul.f32.gmra.mxu1 %v591_v17 }
 0x1ca   : > { %v772_v22 = vmax.f32 %v671_v18, %v740_v20 }
 0x1cc   : > { %868 = vmatmul.f32.gmra.mxu2 %v772_v22 }
 0x1cd   : > { %v673_v27 = vpop.f32.mrf.mxu1 }
 0x1ce   : > { %v674_v29 = vadd.f32 %v2125_v23, %v673_v27 }
 0x1d0   : > { %v741_v31 = vmul.f32 0.2, %v674_v29  ;;  %720 = vmatmul.f32.gmra.mxu1 %v592_v28 }
 0x1d2   : > { %v773_v33 = vmax.f32 %v674_v29, %v741_v31 }
 0x1d4   : > { %871 = vmatmul.f32.gmra.mxu2 %v773_v33 }
 0x1d5   : > { %v676_v34 = vpop.f32.mrf.mxu1 }
 0x1d6   : > { %v677_v36 = vadd.f32 %v2125_v23, %v676_v34 }
 0x1d8   : > { %v742_v37 = vmul.f32 0.2, %v677_v36  ;;  %723 = vmatmul.f32.gmra.mxu1 %v593_v35 }
 0x1da   : > { %v774_v38 = vmax.f32 %v677_v36, %v742_v37  ;;  %v1204_v36 = vld [vmem:[#allocation10 + $0x78] sm:$0xff] }
 0x1db   : > { %1209 = vmatpush.msrb.mxu0 %v1204_v36  ;;  %v1191_v36 = vld [vmem:[#allocation10 + $0x10] sm:$0xff] }
 0x1dc   : > { %874 = vmatmul.f32.gmra.mxu2 %v774_v38  ;;  %v1203_v38 = vld [vmem:[#allocation10 + $0x70] sm:$0xff] }
 0x1dd   : > { %v679_v39 = vpop.f32.mrf.mxu1  ;;  %1210 = vmatpush.msrb.mxu0 %v1203_v38 }
 0x1de   : > { %v680_v40 = vadd.f32 %v2125_v23, %v679_v39 }
 0x1e0   : > { %v743_v41 = vmul.f32 0.2, %v680_v40 }
 0x1e2   : > { %v775_v42 = vmax.f32 %v680_v40, %v743_v41 }
 0x1e4   : > { %877 = vmatmul.f32.gmra.mxu2 %v775_v42 }
 0x1e5   : > { %v682_v43 = vpop.f32.mrf.mxu1 }
 0x1e6   : > { %v683_v44 = vadd.f32 %v2125_v23, %v682_v43 }
 0x1e7   : > { %v830_v45 = vpop.f32.mrf.mxu2 }
 0x1e8   : > { %v744_v46 = vmul.f32 0.2, %v683_v44  ;;  %v831_v47 = vadd.f32 %v2162_v53, %v830_v45 }
 0x1ea   : > { %v776_v48 = vmax.f32 %v683_v44, %v744_v46  ;;  %v926_v49 = vmul.f32 0.2, %v831_v47  ;;  %v1202_v46 = vld [vmem:[#allocation10 + $0x68] sm:$0xff] }
 0x1eb   : > { %1211 = vmatpush.msrb.mxu0 %v1202_v46 }
 0x1ec   : > { %v958_v50 = vmax.f32 %v831_v47, %v926_v49  ;;  %880 = vmatmul.f32.gmra.mxu2 %v776_v48  ;;  %v1201_v48 = vld [vmem:[#allocation10 + $0x60] sm:$0xff] }
 0x1ed   : > { %v685_v51 = vpop.f32.mrf.mxu1  ;;  %1212 = vmatpush.msrb.mxu0 %v1201_v48  ;;  %v1189_v48 = vld [vmem:[#allocation10] sm:$0xff] }
 0x1ee   : > { %v686_v52 = vadd.f32 %v2125_v23, %v685_v51  ;;  %1028 = vmatmul.f32.vlgmr.msrb.gmra.mxu3 %v958_v50 }
 0x1ef   : > { %v833_v54 = vpop.f32.mrf.mxu2 }
 0x1f0   : > { %v745_v55 = vmul.f32 0.2, %v686_v52  ;;  %v834_v56 = vadd.f32 %v2162_v53, %v833_v54 }
 0x1f2   : > { %v777_v57 = vmax.f32 %v686_v52, %v745_v55  ;;  %v927_v58 = vmul.f32 0.2, %v834_v56 }
 0x1f4   : > { %883 = vmatmul.f32.gmra.mxu2 %v777_v57  ;;  %v959_v59 = vmax.f32 %v834_v56, %v927_v58  ;;  %v1200_v57 = vld [vmem:[#allocation10 + $0x58] sm:$0xff] }
 0x1f5   : > { %v688_v60 = vpop.f32.mrf.mxu1  ;;  %1213 = vmatpush.msrb.mxu0 %v1200_v57 }
 0x1f6   : > { %v689_v61 = vadd.f32 %v2125_v23, %v688_v60  ;;  %1031 = vmatmul.f32.gmra.mxu3 %v959_v59  ;;  %v1199_v59 = vld [vmem:[#allocation10 + $0x50] sm:$0xff] }
 0x1f7   : > { %v836_v62 = vpop.f32.mrf.mxu2  ;;  %1214 = vmatpush.msrb.mxu0 %v1199_v59 }
 0x1f8   : > { %v746_v63 = vmul.f32 0.2, %v689_v61  ;;  %v837_v0 = vadd.f32 %v2162_v53, %v836_v62 }
 0x1fa   : > { %v778_v1 = vmax.f32 %v689_v61, %v746_v63  ;;  %v928_v2 = vmul.f32 0.2, %v837_v0 }
 0x1fc   : > { %886 = vmatmul.f32.gmra.mxu2 %v778_v1  ;;  %v960_v3 = vmax.f32 %v837_v0, %v928_v2 }
 0x1fd   : > { %v691_v4 = vpop.f32.mrf.mxu1 }
 0x1fe   : > { %v692_v5 = vadd.f32 %v2125_v23, %v691_v4  ;;  %1034 = vmatmul.f32.gmra.mxu3 %v960_v3  ;;  %v1198_v3 = vld [vmem:[#allocation10 + $0x48] sm:$0xff] }
 0x1ff   : > { %v839_v6 = vpop.f32.mrf.mxu2  ;;  %1215 = vmatpush.msrb.mxu0 %v1198_v3 }
 0x200   : > { %v747_v7 = vmul.f32 0.2, %v692_v5  ;;  %v840_v8 = vadd.f32 %v2162_v53, %v839_v6 }
 0x202   : > { %v779_v9 = vmax.f32 %v692_v5, %v747_v7  ;;  %v929_v10 = vmul.f32 0.2, %v840_v8  ;;  %v1197_v5 = vld [vmem:[#allocation10 + $0x40] sm:$0xff] }
 0x203   : > { %1216 = vmatpush.msrb.mxu0 %v1197_v5 }
 0x204   : > { %889 = vmatmul.f32.gmra.mxu2 %v779_v9  ;;  %v961_v11 = vmax.f32 %v840_v8, %v929_v10 }
 0x205   : > { %v694_v12 = vpop.f32.mrf.mxu1 }
 0x206   : > { %v695_v13 = vadd.f32 %v2125_v23, %v694_v12  ;;  %1037 = vmatmul.f32.gmra.mxu3 %v961_v11 }
 0x207   : > { %v842_v14 = vpop.f32.mrf.mxu2 }
 0x208   : > { %v748_v15 = vmul.f32 0.2, %v695_v13  ;;  %v843_v16 = vadd.f32 %v2162_v53, %v842_v14 }
 0x20a   : > { %v780_v17 = vmax.f32 %v695_v13, %v748_v15  ;;  %v930_v18 = vmul.f32 0.2, %v843_v16  ;;  %v1196_v13 = vld [vmem:[#allocation10 + $0x38] sm:$0xff]  ;;  %v1195_v15 = vld [vmem:[#allocation10 + $0x30] sm:$0xff] }
 0x20b   : > { %1217 = vmatpush.msrb.mxu0 %v1196_v13 }
 0x20c   : > { %892 = vmatmul.f32.gmra.mxu2 %v780_v17  ;;  %v962_v19 = vmax.f32 %v843_v16, %v930_v18 }
 0x20d   : > { %v697_v20 = vpop.f32.mrf.mxu1  ;;  %1218 = vmatpush.msrb.mxu0 %v1195_v15 }
 0x20e   : > { %v698_v21 = vadd.f32 %v2125_v23, %v697_v20  ;;  %1040 = vmatmul.f32.gmra.mxu3 %v962_v19 }
 0x20f   : > { %v845_v22 = vpop.f32.mrf.mxu2 }
 0x210   : > { %v749_v24 = vmul.f32 0.2, %v698_v21  ;;  %v846_v25 = vadd.f32 %v2162_v53, %v845_v22 }
 0x212   : > { %v781_v26 = vmax.f32 %v698_v21, %v749_v24  ;;  %v931_v27 = vmul.f32 0.2, %v846_v25  ;;  %v1194_v24 = vld [vmem:[#allocation10 + $0x28] sm:$0xff] }
 0x213   : > { %1219 = vmatpush.msrb.mxu0 %v1194_v24 }
 0x214   : > { %895 = vmatmul.f32.gmra.mxu2 %v781_v26  ;;  %v963_v28 = vmax.f32 %v846_v25, %v931_v27  ;;  %v1193_v25 = vld [vmem:[#allocation10 + $0x20] sm:$0xff] }
 0x215   : > { %v700_v29 = vpop.f32.mrf.mxu1  ;;  %1220 = vmatpush.msrb.mxu0 %v1193_v25 }
 0x216   : > { %v701_v30 = vadd.f32 %v2125_v23, %v700_v29  ;;  %1043 = vmatmul.f32.gmra.mxu3 %v963_v28 }
 0x217   : > { %v848_v31 = vpop.f32.mrf.mxu2 }
 0x218   : > { %v750_v32 = vmul.f32 0.2, %v701_v30  ;;  %v849_v33 = vadd.f32 %v2162_v53, %v848_v31 }
 0x21a   : > { %v782_v34 = vmax.f32 %v701_v30, %v750_v32  ;;  %v932_v35 = vmul.f32 0.2, %v849_v33 }
 0x21c   : > { %898 = vmatmul.f32.gmra.mxu2 %v782_v34  ;;  %v964_v37 = vmax.f32 %v849_v33, %v932_v35  ;;  %v1192_v35 = vld [vmem:[#allocation10 + $0x18] sm:$0xff] }
 0x21d   : > { %v703_v39 = vpop.f32.mrf.mxu1  ;;  %1221 = vmatpush.msrb.mxu0 %v1192_v35 }
 0x21e   : > { %v704_v40 = vadd.f32 %v2125_v23, %v703_v39  ;;  %1046 = vmatmul.f32.gmra.mxu3 %v964_v37 }
 0x21f   : > { %v851_v41 = vpop.f32.mrf.mxu2  ;;  %1222 = vmatpush.msrb.mxu0 %v1191_v36 }
 0x220   : > { %v751_v42 = vmul.f32 0.2, %v704_v40  ;;  %v852_v43 = vadd.f32 %v2162_v53, %v851_v41 }
 0x222   : > { %v783_v44 = vmax.f32 %v704_v40, %v751_v42  ;;  %v933_v45 = vmul.f32 0.2, %v852_v43 }
 0x224   : > { %901 = vmatmul.f32.gmra.mxu2 %v783_v44  ;;  %v965_v47 = vmax.f32 %v852_v43, %v933_v45  ;;  %v1190_v45 = vld [vmem:[#allocation10 + $0x8] sm:$0xff] }
 0x225   : > { %v706_v49 = vpop.f32.mrf.mxu1  ;;  %1223 = vmatpush.msrb.mxu0 %v1190_v45 }
 0x226   : > { %v707_v50 = vadd.f32 %v2125_v23, %v706_v49  ;;  %1049 = vmatmul.f32.gmra.mxu3 %v965_v47 }
 0x227   : > { %v854_v51 = vpop.f32.mrf.mxu2  ;;  %1224 = vmatpush.msrb.mxu0 %v1189_v48 }
 0x228   : > { %v752_v52 = vmul.f32 0.2, %v707_v50  ;;  %v855_v54 = vadd.f32 %v2162_v53, %v854_v51 }
 0x22a   : > { %v784_v55 = vmax.f32 %v707_v50, %v752_v52  ;;  %v934_v56 = vmul.f32 0.2, %v855_v54 }
 0x22c   : > { %904 = vmatmul.f32.gmra.mxu2 %v784_v55  ;;  %v966_v58 = vmax.f32 %v855_v54, %v934_v56 }
 0x22d   : > { %v709_v60 = vpop.f32.mrf.mxu1 }
 0x22e   : > { %v710_v61 = vadd.f32 %v2125_v23, %v709_v60  ;;  %1052 = vmatmul.f32.gmra.mxu3 %v966_v58 }
 0x22f   : > { %v857_v62 = vpop.f32.mrf.mxu2 }
 0x230   : > { %v753_v63 = vmul.f32 0.2, %v710_v61  ;;  %v858_v0 = vadd.f32 %v2162_v53, %v857_v62 }
 0x232   : > { %v785_v1 = vmax.f32 %v710_v61, %v753_v63  ;;  %v935_v2 = vmul.f32 0.2, %v858_v0  ;;  %v2199_v63 = vld [vmem:[%s2359_s4 + $0x2] ss:$0 sm:$0xff] }
 0x234   : > { %907 = vmatmul.f32.gmra.mxu2 %v785_v1  ;;  %v967_v4 = vmax.f32 %v858_v0, %v935_v2 }
 0x235   : > { %v712_v6 = vpop.f32.mrf.mxu1 }
 0x236   : > { %v713_v7 = vadd.f32 %v2125_v23, %v712_v6  ;;  %1055 = vmatmul.f32.gmra.mxu3 %v967_v4 }
 0x237   : > { %v860_v8 = vpop.f32.mrf.mxu2 }
 0x238   : > { %v754_v9 = vmul.f32 0.2, %v713_v7  ;;  %v861_v10 = vadd.f32 %v2162_v53, %v860_v8 }
 0x23a   : > { %v786_v11 = vmax.f32 %v713_v7, %v754_v9  ;;  %v936_v12 = vmul.f32 0.2, %v861_v10 }
 0x23c   : > { %910 = vmatmul.f32.gmra.mxu2 %v786_v11  ;;  %v968_v14 = vmax.f32 %v861_v10, %v936_v12 }
 0x23d   : > { %v715_v16 = vpop.f32.mrf.mxu1 }
 0x23e   : > { %v716_v17 = vadd.f32 %v2125_v23, %v715_v16  ;;  %1058 = vmatmul.f32.gmra.mxu3 %v968_v14 }
 0x23f   : > { %v863_v18 = vpop.f32.mrf.mxu2 }
 0x240   : > { %v755_v19 = vmul.f32 0.2, %v716_v17  ;;  %v864_v20 = vadd.f32 %v2162_v53, %v863_v18 }
 0x242   : > { %v787_v21 = vmax.f32 %v716_v17, %v755_v19  ;;  %v937_v22 = vmul.f32 0.2, %v864_v20 }
 0x244   : > { %913 = vmatmul.f32.gmra.mxu2 %v787_v21  ;;  %v969_v26 = vmax.f32 %v864_v20, %v937_v22 }
 0x245   : > { %v718_v27 = vpop.f32.mrf.mxu1 }
 0x246   : > { %v719_v28 = vadd.f32 %v2125_v23, %v718_v27  ;;  %1061 = vmatmul.f32.gmra.mxu3 %v969_v26 }
 0x247   : > { %v866_v29 = vpop.f32.mrf.mxu2 }
 0x248   : > { %v756_v30 = vmul.f32 0.2, %v719_v28  ;;  %v867_v31 = vadd.f32 %v2162_v53, %v866_v29 }
 0x24a   : > { %v788_v32 = vmax.f32 %v719_v28, %v756_v30  ;;  %v938_v33 = vmul.f32 0.2, %v867_v31 }
 0x24c   : > { %916 = vmatmul.f32.gmra.mxu2 %v788_v32  ;;  %v970_v34 = vmax.f32 %v867_v31, %v938_v33 }
 0x24d   : > { %v721_v37 = vpop.f32.mrf.mxu1 }
 0x24e   : > { %v722_v38 = vadd.f32 %v2125_v23, %v721_v37  ;;  %1064 = vmatmul.f32.gmra.mxu3 %v970_v34 }
 0x24f   : > { %v869_v39 = vpop.f32.mrf.mxu2 }
 0x250   : > { %v757_v40 = vmul.f32 0.2, %v722_v38  ;;  %v870_v41 = vadd.f32 %v2162_v53, %v869_v39 }
 0x252   : > { %v789_v42 = vmax.f32 %v722_v38, %v757_v40  ;;  %v939_v43 = vmul.f32 0.2, %v870_v41 }
 0x254   : > { %919 = vmatmul.f32.gmra.mxu2 %v789_v42  ;;  %v971_v44 = vmax.f32 %v870_v41, %v939_v43 }
 0x255   : > { %v724_v46 = vpop.f32.mrf.mxu1 }
 0x256   : > { %v725_v47 = vadd.f32 %v2125_v23, %v724_v46  ;;  %1067 = vmatmul.f32.gmra.mxu3 %v971_v44 }
 0x257   : > { %v872_v49 = vpop.f32.mrf.mxu2 }
 0x258   : > { %v758_v50 = vmul.f32 0.2, %v725_v47  ;;  %v873_v51 = vadd.f32 %v2162_v53, %v872_v49 }
 0x25a   : > { %v790_v52 = vmax.f32 %v725_v47, %v758_v50  ;;  %v940_v54 = vmul.f32 0.2, %v873_v51 }
 0x25c   : > { %922 = vmatmul.f32.gmra.mxu2 %v790_v52  ;;  %v972_v55 = vmax.f32 %v873_v51, %v940_v54 }
 0x25e   : > { %1070 = vmatmul.f32.gmra.mxu3 %v972_v55 }
 0x25f   : > { %v875_v56 = vpop.f32.mrf.mxu2 }
 0x260   : > { %v876_v57 = vadd.f32 %v2162_v53, %v875_v56 }
 0x262   : > { %v941_v58 = vmul.f32 0.2, %v876_v57 }
 0x264   : > { %v973_v59 = vmax.f32 %v876_v57, %v941_v58 }
 0x266   : > { %1073 = vmatmul.f32.gmra.mxu3 %v973_v59 }
 0x267   : > { %v878_v60 = vpop.f32.mrf.mxu2 }
 0x268   : > { %v879_v23 = vadd.f32 %v2162_v53, %v878_v60 }
 0x26a   : > { %v942_v61 = vmul.f32 0.2, %v879_v23 }
 0x26c   : > { %v974_v62 = vmax.f32 %v879_v23, %v942_v61 }
 0x26e   : > { %1076 = vmatmul.f32.gmra.mxu3 %v974_v62 }
 0x26f   : > { %v881_v0 = vpop.f32.mrf.mxu2 }
 0x270   : > { %v882_v1 = vadd.f32 %v2162_v53, %v881_v0 }
 0x271   : > { %v1029_v2 = vpop.f32.mrf.mxu3 }
 0x272   : > { %v943_v3 = vmul.f32 0.2, %v882_v1  ;;  %v1030_v4 = vadd.f32 %v2199_v63, %v1029_v2 }
 0x274   : > { %v975_v5 = vmax.f32 %v882_v1, %v943_v3  ;;  %v1125_v6 = vmul.f32 0.2, %v1030_v4 }
 0x276   : > { %v1157_v7 = vmax.f32 %v1030_v4, %v1125_v6  ;;  %1079 = vmatmul.f32.gmra.mxu3 %v975_v5 }
 0x277   : > { %v884_v8 = vpop.f32.mrf.mxu2 }
 0x278   : > { %v885_v9 = vadd.f32 %v2162_v53, %v884_v8  ;;  %1225 = vmatmul.f32.vlgmr.msrb.gmra.mxu0 %v1157_v7 }
 0x279   : > { %v1032_v10 = vpop.f32.mrf.mxu3 }
 0x27a   : > { %v944_v11 = vmul.f32 0.2, %v885_v9  ;;  %v1033_v12 = vadd.f32 %v2199_v63, %v1032_v10 }
 0x27c   : > { %v976_v13 = vmax.f32 %v885_v9, %v944_v11  ;;  %v1126_v14 = vmul.f32 0.2, %v1033_v12 }
 0x27e   : > { %1082 = vmatmul.f32.gmra.mxu3 %v976_v13  ;;  %v1158_v15 = vmax.f32 %v1033_v12, %v1126_v14 }
 0x27f   : > { %v887_v16 = vpop.f32.mrf.mxu2 }
 0x280   : > { %v888_v17 = vadd.f32 %v2162_v53, %v887_v16  ;;  %1228 = vmatmul.f32.gmra.mxu0 %v1158_v15 }
 0x281   : > { %v1035_v18 = vpop.f32.mrf.mxu3 }
 0x282   : > { %v945_v19 = vmul.f32 0.2, %v888_v17  ;;  %v1036_v20 = vadd.f32 %v2199_v63, %v1035_v18 }
 0x284   : > { %v977_v21 = vmax.f32 %v888_v17, %v945_v19  ;;  %v1127_v22 = vmul.f32 0.2, %v1036_v20 }
 0x286   : > { %1085 = vmatmul.f32.gmra.mxu3 %v977_v21  ;;  %v1159_v24 = vmax.f32 %v1036_v20, %v1127_v22 }
 0x287   : > { %v890_v25 = vpop.f32.mrf.mxu2 }
 0x288   : > { %v891_v26 = vadd.f32 %v2162_v53, %v890_v25  ;;  %1231 = vmatmul.f32.gmra.mxu0 %v1159_v24 }
 0x289   : > { %v1038_v27 = vpop.f32.mrf.mxu3 }
 0x28a   : > { %v946_v28 = vmul.f32 0.2, %v891_v26  ;;  %v1039_v29 = vadd.f32 %v2199_v63, %v1038_v27 }
 0x28c   : > { %v978_v30 = vmax.f32 %v891_v26, %v946_v28  ;;  %v1128_v31 = vmul.f32 0.2, %v1039_v29 }
 0x28e   : > { %1088 = vmatmul.f32.gmra.mxu3 %v978_v30  ;;  %v1160_v32 = vmax.f32 %v1039_v29, %v1128_v31 }
 0x28f   : > { %v893_v33 = vpop.f32.mrf.mxu2 }
 0x290   : > { %v894_v34 = vadd.f32 %v2162_v53, %v893_v33  ;;  %1234 = vmatmul.f32.gmra.mxu0 %v1160_v32 }
 0x291   : > { %v1041_v35 = vpop.f32.mrf.mxu3 }
 0x292   : > { %v947_v36 = vmul.f32 0.2, %v894_v34  ;;  %v1042_v37 = vadd.f32 %v2199_v63, %v1041_v35 }
 0x294   : > { %v979_v38 = vmax.f32 %v894_v34, %v947_v36  ;;  %v1129_v39 = vmul.f32 0.2, %v1042_v37 }
 0x296   : > { %1091 = vmatmul.f32.gmra.mxu3 %v979_v38  ;;  %v1161_v40 = vmax.f32 %v1042_v37, %v1129_v39 }
 0x297   : > { %v896_v41 = vpop.f32.mrf.mxu2 }
 0x298   : > { %v897_v42 = vadd.f32 %v2162_v53, %v896_v41  ;;  %1237 = vmatmul.f32.gmra.mxu0 %v1161_v40 }
 0x299   : > { %v1044_v43 = vpop.f32.mrf.mxu3 }
 0x29a   : > { %v948_v44 = vmul.f32 0.2, %v897_v42  ;;  %v1045_v45 = vadd.f32 %v2199_v63, %v1044_v43 }
 0x29c   : > { %v980_v46 = vmax.f32 %v897_v42, %v948_v44  ;;  %v1130_v47 = vmul.f32 0.2, %v1045_v45 }
 0x29e   : > { %1094 = vmatmul.f32.gmra.mxu3 %v980_v46  ;;  %v1162_v48 = vmax.f32 %v1045_v45, %v1130_v47 }
 0x29f   : > { %v899_v49 = vpop.f32.mrf.mxu2 }
 0x2a0   : > { %v900_v50 = vadd.f32 %v2162_v53, %v899_v49  ;;  %1240 = vmatmul.f32.gmra.mxu0 %v1162_v48 }
 0x2a1   : > { %v1047_v51 = vpop.f32.mrf.mxu3 }
 0x2a2   : > { %v949_v52 = vmul.f32 0.2, %v900_v50  ;;  %v1048_v54 = vadd.f32 %v2199_v63, %v1047_v51 }
 0x2a4   : > { %v981_v55 = vmax.f32 %v900_v50, %v949_v52  ;;  %v1131_v56 = vmul.f32 0.2, %v1048_v54 }
 0x2a6   : > { %1097 = vmatmul.f32.gmra.mxu3 %v981_v55  ;;  %v1163_v57 = vmax.f32 %v1048_v54, %v1131_v56 }
 0x2a7   : > { %v902_v58 = vpop.f32.mrf.mxu2 }
 0x2a8   : > { %v903_v59 = vadd.f32 %v2162_v53, %v902_v58  ;;  %1243 = vmatmul.f32.gmra.mxu0 %v1163_v57 }
 0x2a9   : > { %v1050_v60 = vpop.f32.mrf.mxu3 }
 0x2aa   : > { %v950_v23 = vmul.f32 0.2, %v903_v59  ;;  %v1051_v61 = vadd.f32 %v2199_v63, %v1050_v60 }
 0x2ac   : > { %v982_v62 = vmax.f32 %v903_v59, %v950_v23  ;;  %v1132_v0 = vmul.f32 0.2, %v1051_v61 }
 0x2ae   : > { %1100 = vmatmul.f32.gmra.mxu3 %v982_v62  ;;  %v1164_v1 = vmax.f32 %v1051_v61, %v1132_v0 }
 0x2af   : > { %v905_v2 = vpop.f32.mrf.mxu2 }
 0x2b0   : > { %v906_v3 = vadd.f32 %v2162_v53, %v905_v2  ;;  %1246 = vmatmul.f32.gmra.mxu0 %v1164_v1  ;;  %v2236_v1 = vld [vmem:[%s2361_s6] ss:$0 sm:$0xff] }
 0x2b1   : > { %v1053_v4 = vpop.f32.mrf.mxu3 }
 0x2b2   : > { %v951_v5 = vmul.f32 0.2, %v906_v3  ;;  %v1054_v6 = vadd.f32 %v2199_v63, %v1053_v4 }
 0x2b4   : > { %v983_v7 = vmax.f32 %v906_v3, %v951_v5  ;;  %v1133_v8 = vmul.f32 0.2, %v1054_v6 }
 0x2b6   : > { %1103 = vmatmul.f32.gmra.mxu3 %v983_v7  ;;  %v1165_v9 = vmax.f32 %v1054_v6, %v1133_v8 }
 0x2b7   : > { %v908_v10 = vpop.f32.mrf.mxu2 }
 0x2b8   : > { %v909_v11 = vadd.f32 %v2162_v53, %v908_v10  ;;  %1249 = vmatmul.f32.gmra.mxu0 %v1165_v9 }
 0x2b9   : > { %v1056_v12 = vpop.f32.mrf.mxu3 }
 0x2ba   : > { %v952_v13 = vmul.f32 0.2, %v909_v11  ;;  %v1057_v14 = vadd.f32 %v2199_v63, %v1056_v12 }
 0x2bc   : > { %v984_v15 = vmax.f32 %v909_v11, %v952_v13  ;;  %v1134_v16 = vmul.f32 0.2, %v1057_v14 }
 0x2be   : > { %1106 = vmatmul.f32.gmra.mxu3 %v984_v15  ;;  %v1166_v17 = vmax.f32 %v1057_v14, %v1134_v16 }
 0x2bf   : > { %v911_v18 = vpop.f32.mrf.mxu2 }
 0x2c0   : > { %v912_v19 = vadd.f32 %v2162_v53, %v911_v18  ;;  %1252 = vmatmul.f32.gmra.mxu0 %v1166_v17 }
 0x2c1   : > { %v1059_v20 = vpop.f32.mrf.mxu3 }
 0x2c2   : > { %v953_v21 = vmul.f32 0.2, %v912_v19  ;;  %v1060_v22 = vadd.f32 %v2199_v63, %v1059_v20 }
 0x2c4   : > { %v985_v24 = vmax.f32 %v912_v19, %v953_v21  ;;  %v1135_v25 = vmul.f32 0.2, %v1060_v22 }
 0x2c6   : > { %1109 = vmatmul.f32.gmra.mxu3 %v985_v24  ;;  %v1167_v26 = vmax.f32 %v1060_v22, %v1135_v25 }
 0x2c7   : > { %v914_v27 = vpop.f32.mrf.mxu2 }
 0x2c8   : > { %v915_v28 = vadd.f32 %v2162_v53, %v914_v27  ;;  %1255 = vmatmul.f32.gmra.mxu0 %v1167_v26 }
 0x2c9   : > { %v1062_v29 = vpop.f32.mrf.mxu3 }
 0x2ca   : > { %v954_v30 = vmul.f32 0.2, %v915_v28  ;;  %v1063_v31 = vadd.f32 %v2199_v63, %v1062_v29 }
 0x2cc   : > { %v986_v32 = vmax.f32 %v915_v28, %v954_v30  ;;  %v1136_v33 = vmul.f32 0.2, %v1063_v31 }
 0x2ce   : > { %1112 = vmatmul.f32.gmra.mxu3 %v986_v32  ;;  %v1168_v34 = vmax.f32 %v1063_v31, %v1136_v33 }
 0x2cf   : > { %v917_v35 = vpop.f32.mrf.mxu2 }
 0x2d0   : > { %v918_v36 = vadd.f32 %v2162_v53, %v917_v35  ;;  %1258 = vmatmul.f32.gmra.mxu0 %v1168_v34 }
 0x2d1   : > { %v1065_v37 = vpop.f32.mrf.mxu3 }
 0x2d2   : > { %v955_v38 = vmul.f32 0.2, %v918_v36  ;;  %v1066_v39 = vadd.f32 %v2199_v63, %v1065_v37 }
 0x2d4   : > { %v987_v40 = vmax.f32 %v918_v36, %v955_v38  ;;  %v1137_v41 = vmul.f32 0.2, %v1066_v39 }
 0x2d6   : > { %1115 = vmatmul.f32.gmra.mxu3 %v987_v40  ;;  %v1169_v42 = vmax.f32 %v1066_v39, %v1137_v41 }
 0x2d7   : > { %v920_v43 = vpop.f32.mrf.mxu2 }
 0x2d8   : > { %v921_v44 = vadd.f32 %v2162_v53, %v920_v43  ;;  %1261 = vmatmul.f32.gmra.mxu0 %v1169_v42 }
 0x2d9   : > { %v1068_v45 = vpop.f32.mrf.mxu3 }
 0x2da   : > { %v956_v46 = vmul.f32 0.2, %v921_v44  ;;  %v1069_v47 = vadd.f32 %v2199_v63, %v1068_v45 }
 0x2dc   : > { %v988_v48 = vmax.f32 %v921_v44, %v956_v46  ;;  %v1138_v49 = vmul.f32 0.2, %v1069_v47 }
 0x2de   : > { %1118 = vmatmul.f32.gmra.mxu3 %v988_v48  ;;  %v1170_v50 = vmax.f32 %v1069_v47, %v1138_v49 }
 0x2df   : > { %v923_v51 = vpop.f32.mrf.mxu2 }
 0x2e0   : > { %v924_v52 = vadd.f32 %v2162_v53, %v923_v51  ;;  %1264 = vmatmul.f32.gmra.mxu0 %v1170_v50 }
 0x2e1   : > { %v1071_v54 = vpop.f32.mrf.mxu3 }
 0x2e2   : > { %v957_v55 = vmul.f32 0.2, %v924_v52  ;;  %v1072_v56 = vadd.f32 %v2199_v63, %v1071_v54 }
 0x2e4   : > { %v989_v57 = vmax.f32 %v924_v52, %v957_v55  ;;  %v1139_v58 = vmul.f32 0.2, %v1072_v56 }
 0x2e6   : > { %1121 = vmatmul.f32.gmra.mxu3 %v989_v57  ;;  %v1171_v59 = vmax.f32 %v1072_v56, %v1139_v58 }
 0x2e8   : > { %1267 = vmatmul.f32.gmra.mxu0 %v1171_v59 }
 0x2e9   : > { %v1074_v60 = vpop.f32.mrf.mxu3 }
 0x2ea   : > { %v1075_v23 = vadd.f32 %v2199_v63, %v1074_v60 }
 0x2ec   : > { %v1140_v61 = vmul.f32 0.2, %v1075_v23 }
 0x2ee   : > { %v1172_v62 = vmax.f32 %v1075_v23, %v1140_v61 }
 0x2f0   : > { %1270 = vmatmul.f32.gmra.mxu0 %v1172_v62 }
 0x2f1   : > { %v1077_v0 = vpop.f32.mrf.mxu3 }
 0x2f2   : > { %v1078_v53 = vadd.f32 %v2199_v63, %v1077_v0 }
 0x2f4   : > { %v1141_v2 = vmul.f32 0.2, %v1078_v53 }
 0x2f5   : > { %v1226_v3 = vpop.f32.mrf.mxu0 }
 0x2f6   : > { %v1173_v4 = vmax.f32 %v1078_v53, %v1141_v2  ;;  %v1227_v5 = vadd.f32 %v2236_v1, %v1226_v3 }
 0x2f8   : > { %1322 = vst [vmem:[%s2241_s16] sm:$0xff] %v1227_v5  ;;  %1273 = vmatmul.f32.gmra.mxu0 %v1173_v4 }
 0x2f9   : > { %v1080_v6 = vpop.f32.mrf.mxu3 }
 0x2fa   : > { %v1081_v7 = vadd.f32 %v2199_v63, %v1080_v6 }
 0x2fc   : > { %v1142_v8 = vmul.f32 0.2, %v1081_v7 }
 0x2fd   : > { %v1229_v9 = vpop.f32.mrf.mxu0 }
 0x2fe   : > { %v1174_v10 = vmax.f32 %v1081_v7, %v1142_v8  ;;  %v1230_v11 = vadd.f32 %v2236_v1, %v1229_v9 }
 0x300   : > { %1323 = vst [vmem:[%s2241_s16 + $0x8] sm:$0xff] %v1230_v11  ;;  %1276 = vmatmul.f32.gmra.mxu0 %v1174_v10 }
 0x301   : > { %v1083_v12 = vpop.f32.mrf.mxu3 }
 0x302   : > { %v1084_v13 = vadd.f32 %v2199_v63, %v1083_v12 }
 0x304   : > { %v1143_v14 = vmul.f32 0.2, %v1084_v13 }
 0x305   : > { %v1232_v15 = vpop.f32.mrf.mxu0 }
 0x306   : > { %v1175_v16 = vmax.f32 %v1084_v13, %v1143_v14  ;;  %v1233_v17 = vadd.f32 %v2236_v1, %v1232_v15 }
 0x308   : > { %1324 = vst [vmem:[%s2241_s16 + $0x10] sm:$0xff] %v1233_v17  ;;  %1279 = vmatmul.f32.gmra.mxu0 %v1175_v16 }
 0x309   : > { %v1086_v18 = vpop.f32.mrf.mxu3 }
 0x30a   : > { %v1087_v19 = vadd.f32 %v2199_v63, %v1086_v18 }
 0x30c   : > { %v1144_v20 = vmul.f32 0.2, %v1087_v19 }
 0x30d   : > { %v1235_v21 = vpop.f32.mrf.mxu0 }
 0x30e   : > { %v1176_v22 = vmax.f32 %v1087_v19, %v1144_v20  ;;  %v1236_v24 = vadd.f32 %v2236_v1, %v1235_v21 }
 0x310   : > { %1325 = vst [vmem:[%s2241_s16 + $0x18] sm:$0xff] %v1236_v24  ;;  %1282 = vmatmul.f32.gmra.mxu0 %v1176_v22 }
 0x311   : > { %v1089_v25 = vpop.f32.mrf.mxu3 }
 0x312   : > { %v1090_v26 = vadd.f32 %v2199_v63, %v1089_v25 }
 0x314   : > { %v1145_v27 = vmul.f32 0.2, %v1090_v26 }
 0x315   : > { %v1238_v28 = vpop.f32.mrf.mxu0 }
 0x316   : > { %v1177_v29 = vmax.f32 %v1090_v26, %v1145_v27  ;;  %v1239_v30 = vadd.f32 %v2236_v1, %v1238_v28 }
 0x318   : > { %1326 = vst [vmem:[%s2241_s16 + $0x20] sm:$0xff] %v1239_v30  ;;  %1285 = vmatmul.f32.gmra.mxu0 %v1177_v29 }
 0x319   : > { %v1092_v31 = vpop.f32.mrf.mxu3 }
 0x31a   : > { %v1093_v32 = vadd.f32 %v2199_v63, %v1092_v31 }
 0x31c   : > { %v1146_v33 = vmul.f32 0.2, %v1093_v32 }
 0x31d   : > { %v1241_v34 = vpop.f32.mrf.mxu0 }
 0x31e   : > { %v1178_v35 = vmax.f32 %v1093_v32, %v1146_v33  ;;  %v1242_v36 = vadd.f32 %v2236_v1, %v1241_v34 }
 0x320   : > { %1327 = vst [vmem:[%s2241_s16 + $0x28] sm:$0xff] %v1242_v36  ;;  %1288 = vmatmul.f32.gmra.mxu0 %v1178_v35 }
 0x321   : > { %v1095_v37 = vpop.f32.mrf.mxu3 }
 0x322   : > { %v1096_v38 = vadd.f32 %v2199_v63, %v1095_v37 }
 0x324   : > { %v1147_v39 = vmul.f32 0.2, %v1096_v38 }
 0x325   : > { %v1244_v40 = vpop.f32.mrf.mxu0 }
 0x326   : > { %v1179_v41 = vmax.f32 %v1096_v38, %v1147_v39  ;;  %v1245_v42 = vadd.f32 %v2236_v1, %v1244_v40 }
 0x328   : > { %1328 = vst [vmem:[%s2241_s16 + $0x30] sm:$0xff] %v1245_v42  ;;  %1291 = vmatmul.f32.gmra.mxu0 %v1179_v41 }
 0x329   : > { %v1098_v43 = vpop.f32.mrf.mxu3 }
 0x32a   : > { %v1099_v44 = vadd.f32 %v2199_v63, %v1098_v43 }
 0x32c   : > { %v1148_v45 = vmul.f32 0.2, %v1099_v44 }
 0x32d   : > { %v1247_v46 = vpop.f32.mrf.mxu0 }
 0x32e   : > { %v1180_v47 = vmax.f32 %v1099_v44, %v1148_v45  ;;  %v1248_v48 = vadd.f32 %v2236_v1, %v1247_v46 }
 0x330   : > { %1329 = vst [vmem:[%s2241_s16 + $0x38] sm:$0xff] %v1248_v48  ;;  %1294 = vmatmul.f32.gmra.mxu0 %v1180_v47 }
 0x331   : > { %v1101_v49 = vpop.f32.mrf.mxu3 }
 0x332   : > { %v1102_v50 = vadd.f32 %v2199_v63, %v1101_v49 }
 0x334   : > { %v1149_v51 = vmul.f32 0.2, %v1102_v50 }
 0x335   : > { %v1250_v52 = vpop.f32.mrf.mxu0 }
 0x336   : > { %v1181_v54 = vmax.f32 %v1102_v50, %v1149_v51  ;;  %v1251_v55 = vadd.f32 %v2236_v1, %v1250_v52 }
 0x338   : > { %1330 = vst [vmem:[%s2241_s16 + $0x40] sm:$0xff] %v1251_v55  ;;  %1297 = vmatmul.f32.gmra.mxu0 %v1181_v54 }
 0x339   : > { %v1104_v56 = vpop.f32.mrf.mxu3 }
 0x33a   : > { %v1105_v57 = vadd.f32 %v2199_v63, %v1104_v56 }
 0x33c   : > { %v1150_v58 = vmul.f32 0.2, %v1105_v57 }
 0x33d   : > { %v1253_v59 = vpop.f32.mrf.mxu0 }
 0x33e   : > { %v1182_v60 = vmax.f32 %v1105_v57, %v1150_v58  ;;  %v1254_v23 = vadd.f32 %v2236_v1, %v1253_v59 }
 0x340   : > { %1331 = vst [vmem:[%s2241_s16 + $0x48] sm:$0xff] %v1254_v23  ;;  %1300 = vmatmul.f32.gmra.mxu0 %v1182_v60 }
 0x341   : > { %v1107_v61 = vpop.f32.mrf.mxu3 }
 0x342   : > { %v1108_v62 = vadd.f32 %v2199_v63, %v1107_v61 }
 0x344   : > { %v1151_v0 = vmul.f32 0.2, %v1108_v62 }
 0x345   : > { %v1256_v53 = vpop.f32.mrf.mxu0 }
 0x346   : > { %v1183_v2 = vmax.f32 %v1108_v62, %v1151_v0  ;;  %v1257_v3 = vadd.f32 %v2236_v1, %v1256_v53 }
 0x348   : > { %1332 = vst [vmem:[%s2241_s16 + $0x50] sm:$0xff] %v1257_v3  ;;  %1303 = vmatmul.f32.gmra.mxu0 %v1183_v2 }
 0x349   : > { %v1110_v4 = vpop.f32.mrf.mxu3 }
 0x34a   : > { %v1111_v5 = vadd.f32 %v2199_v63, %v1110_v4 }
 0x34c   : > { %v1152_v6 = vmul.f32 0.2, %v1111_v5 }
 0x34d   : > { %v1259_v7 = vpop.f32.mrf.mxu0 }
 0x34e   : > { %v1184_v8 = vmax.f32 %v1111_v5, %v1152_v6  ;;  %v1260_v9 = vadd.f32 %v2236_v1, %v1259_v7 }
 0x350   : > { %1333 = vst [vmem:[%s2241_s16 + $0x58] sm:$0xff] %v1260_v9  ;;  %1306 = vmatmul.f32.gmra.mxu0 %v1184_v8 }
 0x351   : > { %v1113_v10 = vpop.f32.mrf.mxu3 }
 0x352   : > { %v1114_v11 = vadd.f32 %v2199_v63, %v1113_v10 }
 0x354   : > { %v1153_v12 = vmul.f32 0.2, %v1114_v11 }
 0x355   : > { %v1262_v13 = vpop.f32.mrf.mxu0 }
 0x356   : > { %v1185_v14 = vmax.f32 %v1114_v11, %v1153_v12  ;;  %v1263_v15 = vadd.f32 %v2236_v1, %v1262_v13 }
 0x358   : > { %1334 = vst [vmem:[%s2241_s16 + $0x60] sm:$0xff] %v1263_v15  ;;  %1309 = vmatmul.f32.gmra.mxu0 %v1185_v14 }
 0x359   : > { %v1116_v16 = vpop.f32.mrf.mxu3 }
 0x35a   : > { %v1117_v17 = vadd.f32 %v2199_v63, %v1116_v16 }
 0x35c   : > { %v1154_v18 = vmul.f32 0.2, %v1117_v17 }
 0x35d   : > { %v1265_v19 = vpop.f32.mrf.mxu0 }
 0x35e   : > { %v1186_v20 = vmax.f32 %v1117_v17, %v1154_v18  ;;  %v1266_v21 = vadd.f32 %v2236_v1, %v1265_v19 }
 0x360   : > { %1335 = vst [vmem:[%s2241_s16 + $0x68] sm:$0xff] %v1266_v21  ;;  %1312 = vmatmul.f32.gmra.mxu0 %v1186_v20 }
 0x361   : > { %v1119_v22 = vpop.f32.mrf.mxu3 }
 0x362   : > { %v1120_v24 = vadd.f32 %v2199_v63, %v1119_v22 }
 0x364   : > { %v1155_v25 = vmul.f32 0.2, %v1120_v24 }
 0x365   : > { %v1268_v26 = vpop.f32.mrf.mxu0 }
 0x366   : > { %v1187_v27 = vmax.f32 %v1120_v24, %v1155_v25  ;;  %v1269_v28 = vadd.f32 %v2236_v1, %v1268_v26 }
 0x368   : > { %1336 = vst [vmem:[%s2241_s16 + $0x70] sm:$0xff] %v1269_v28  ;;  %1315 = vmatmul.f32.gmra.mxu0 %v1187_v27 }
 0x369   : > { %v1122_v29 = vpop.f32.mrf.mxu3 }
 0x36a   : > { %v1123_v30 = vadd.f32 %v2199_v63, %v1122_v29 }
 0x36c   : > { %v1156_v31 = vmul.f32 0.2, %v1123_v30 }
 0x36d   : > { %v1271_v32 = vpop.f32.mrf.mxu0 }
 0x36e   : > { %v1188_v33 = vmax.f32 %v1123_v30, %v1156_v31  ;;  %v1272_v34 = vadd.f32 %v2236_v1, %v1271_v32 }
 0x370   : > { %1337 = vst [vmem:[%s2241_s16 + $0x78] sm:$0xff] %v1272_v34  ;;  %1318 = vmatmul.f32.gmra.mxu0 %v1188_v33 }
 0x375   : > { %v1274_v35 = vpop.f32.mrf.mxu0 }
 0x376   : > { %v1275_v36 = vadd.f32 %v2236_v1, %v1274_v35 }
 0x378   : > { %1338 = vst [vmem:[%s2241_s16 + $0x80] sm:$0xff] %v1275_v36 }
 0x37d   : > { %v1277_v37 = vpop.f32.mrf.mxu0 }
 0x37e   : > { %v1278_v38 = vadd.f32 %v2236_v1, %v1277_v37 }
 0x380   : > { %1339 = vst [vmem:[%s2241_s16 + $0x88] sm:$0xff] %v1278_v38 }
 0x385   : > { %v1280_v63 = vpop.f32.mrf.mxu0 }
 0x386   : > { %v1281_v39 = vadd.f32 %v2236_v1, %v1280_v63 }
 0x388   : > { %1340 = vst [vmem:[%s2241_s16 + $0x90] sm:$0xff] %v1281_v39 }
 0x38d   : > { %v1283_v40 = vpop.f32.mrf.mxu0 }
 0x38e   : > { %v1284_v41 = vadd.f32 %v2236_v1, %v1283_v40 }
 0x390   : > { %1341 = vst [vmem:[%s2241_s16 + $0x98] sm:$0xff] %v1284_v41 }
 0x395   : > { %v1286_v42 = vpop.f32.mrf.mxu0 }
 0x396   : > { %v1287_v43 = vadd.f32 %v2236_v1, %v1286_v42 }
 0x398   : > { %1342 = vst [vmem:[%s2241_s16 + $0xa0] sm:$0xff] %v1287_v43 }
 0x39d   : > { %v1289_v44 = vpop.f32.mrf.mxu0 }
 0x39e   : > { %v1290_v45 = vadd.f32 %v2236_v1, %v1289_v44 }
 0x3a0   : > { %1343 = vst [vmem:[%s2241_s16 + $0xa8] sm:$0xff] %v1290_v45 }
 0x3a5   : > { %v1292_v46 = vpop.f32.mrf.mxu0 }
 0x3a6   : > { %v1293_v47 = vadd.f32 %v2236_v1, %v1292_v46 }
 0x3a8   : > { %1344 = vst [vmem:[%s2241_s16 + $0xb0] sm:$0xff] %v1293_v47 }
 0x3ad   : > { %v1295_v48 = vpop.f32.mrf.mxu0 }
 0x3ae   : > { %v1296_v49 = vadd.f32 %v2236_v1, %v1295_v48 }
 0x3b0   : > { %1345 = vst [vmem:[%s2241_s16 + $0xb8] sm:$0xff] %v1296_v49 }
 0x3b5   : > { %v1298_v50 = vpop.f32.mrf.mxu0 }
 0x3b6   : > { %v1299_v51 = vadd.f32 %v2236_v1, %v1298_v50 }
 0x3b8   : > { %1346 = vst [vmem:[%s2241_s16 + $0xc0] sm:$0xff] %v1299_v51 }
 0x3bd   : > { %v1301_v52 = vpop.f32.mrf.mxu0 }
 0x3be   : > { %v1302_v54 = vadd.f32 %v2236_v1, %v1301_v52 }
 0x3c0   : > { %1347 = vst [vmem:[%s2241_s16 + $0xc8] sm:$0xff] %v1302_v54 }
 0x3c5   : > { %v1304_v55 = vpop.f32.mrf.mxu0 }
 0x3c6   : > { %v1305_v56 = vadd.f32 %v2236_v1, %v1304_v55 }
 0x3c8   : > { %1348 = vst [vmem:[%s2241_s16 + $0xd0] sm:$0xff] %v1305_v56 }
 0x3cd   : > { %v1307_v57 = vpop.f32.mrf.mxu0 }
 0x3ce   : > { %v1308_v58 = vadd.f32 %v2236_v1, %v1307_v57 }
 0x3d0   : > { %1349 = vst [vmem:[%s2241_s16 + $0xd8] sm:$0xff] %v1308_v58 }
 0x3d5   : > { %v1310_v59 = vpop.f32.mrf.mxu0 }
 0x3d6   : > { %v1311_v60 = vadd.f32 %v2236_v1, %v1310_v59 }
 0x3d8   : > { %1350 = vst [vmem:[%s2241_s16 + $0xe0] sm:$0xff] %v1311_v60 }
 0x3dd   : > { %v1313_v23 = vpop.f32.mrf.mxu0 }
 0x3de   : > { %v1314_v61 = vadd.f32 %v2236_v1, %v1313_v23 }
 0x3e0   : > { %1351 = vst [vmem:[%s2241_s16 + $0xe8] sm:$0xff] %v1314_v61 }
 0x3e5   : > { %v1316_v62 = vpop.f32.mrf.mxu0 }
 0x3e6   : > { %v1317_v0 = vadd.f32 %v2236_v1, %v1316_v62 }
 0x3e8   : > { %1352 = vst [vmem:[%s2241_s16 + $0xf0] sm:$0xff] %v1317_v0 }
 0x3ed   : > { %v1319_v53 = vpop.f32.mrf.mxu0 }
 0x3ee   : > { %v1320_v2 = vadd.f32 %v2236_v1, %v1319_v53 }
 0x3f0   : > { %1353 = vst [vmem:[%s2241_s16 + $0xf8] sm:$0xff] %v1320_v2 }
 0x3f1   : > { %1828 = shalt.err (!%p1825_p10)
}
 0x3f2   : > { %s1883_s11 = smov 128   ;;  %s1884_s16 = smov 8  }
 0x3f3   : > { %1573 = dma.vmem_to_hbm [thread:$0]  (%p2018_p3), %s1368_s10, 4096, %s1370_s30, %s1355_s12, %s1883_s11, %s1883_s11, %s1884_s16  }
 0x3f4 PF: > { %s1384_s15 = sand.u32 1, %s1863_s24   ;;  %p2375_p12 = scmp.ge.s32.totalorder %s1875_s27, 2 }
 0x3f5   : > { %s1385_s17 = scalar_lea.sflag [#allocation4], %s1384_s15 }
 0x3f6   : > { %p1593_p13 = pnand %p2375_p12, %p1960_p6 }
 0x3f8   : > { %p1594_p0 = pneg %p1593_p13 }
 0x3fa   : > { %1858 = dma.done.wait (%p1594_p0), %s1385_s17, 4096  }
 0x3fb   : > { %1860 = vsyncadd (%p1594_p0), %s1385_s17, 4294963200  ;;  %p22_p5 = scmp.ge.s32.totalorder %s2008_s18, 4   ;;  %s2376_s24 = smov %s1867_s25 }
 0x3fc   : > { %s2377_s25 = smov %s1871_s26  ;;  %s2378_s26 = smov %s2024_s9 }
 0x3fd   : > { %s2379_s27 = smov %s2008_s18  ;;  %24 = sbr.rel (!%p22_p5) target bundleno = 9 (0x9), region = 113 }
 0x402   :  { %1391 = vsyncpa [#allocation3], 1 }
 0x403   :  { %1393 = vsyncpa [#allocation3 + $0x1], 1 }
 0x404   :  { %1394 = vsyncpa [#allocation6], 1 }
 0x405   :  { %1395 = vsyncpa [#allocation9], 1 }
 0x406   :  { %1396 = vsyncpa [#allocation4], 1 }
 0x407   :  { %1398 = vsyncpa [#allocation4 + $0x1], 1 }

</bundles_post_ra>
